<compile_context>
chip_gen: v7x
topology: tpu7x:2x2x1
jax: 0.10.0
libtpu: 0.0.40
codegen_flags: <defaults>
</compile_context>

<pallas_src>
import jax
import jax.numpy as jnp
from jax import lax
from jax.experimental import pallas as pl
from jax.experimental.pallas import tpu as pltpu


# ------------------------------ fused kernel ----------------------------------

def _down_conv_kernel(x_ref, psel_ref, shift_ref, w1_ref, w2_ref, bias_ref,
                      o_ref):
    """MaxPool2x2 -> (Conv3x3 + BN + ReLU) x 2, channels-first, one grid step.

    x_ref    : (N*Cin, H*W)         NCHW input, spatial flattened on lanes
    psel_ref : (H*W, 4*P)           0/1 pooling phase selector, P = Ho*Wo
    shift_ref: (9, P, P)            0/1 per-tap spatial shift (zero pad baked in)
    w1_ref   : (9, N*Cout, N*Cin)   conv1 weights, BN1 scale folded, block-diag per batch
    w2_ref   : (9, N*Cout, N*Cout)  conv2 weights, BN2 scale folded, block-diag per batch
    bias_ref : (2, N*Cout, 1)       folded (conv bias -> BN) biases for both convs
    o_ref    : (N*Cout, P)          output; free-reshapes to NCHW in the wrapper
    """
    p = o_ref.shape[-1]

    # ---- MaxPool2d(2,2): one exact selector matmul + 3 maxes -----------------
    # ph[:, phase*P + m] == x at the (phase)-corner of pooled output pixel m.
    ph = jnp.dot(x_ref[...], psel_ref[...], preferred_element_type=jnp.float32)
    pooled = jnp.maximum(jnp.maximum(ph[:, 0 * p:1 * p], ph[:, 1 * p:2 * p]),
                         jnp.maximum(ph[:, 2 * p:3 * p], ph[:, 3 * p:4 * p]))

    # ---- 3x3 SAME conv + folded BN + ReLU: 9 accumulated tap matmuls ---------
    def conv3x3_bn_relu(act, w_ref, bias):
        rows_out = w_ref.shape[1]
        acc = jnp.zeros((rows_out, p), jnp.float32)
        for t in range(9):
            # Spatial shift with zero padding (exact 0/1 matrix, MXU slot).
            # TODO(synk): at realistic Ho*Wo, replace with pltpu.roll on the
            #             lane axis + jnp.where border masks (O(P) XLU work
            #             instead of an O(P^2) shift matrix).
            shifted = jnp.dot(act, shift_ref[t],
                              preferred_element_type=jnp.float32)
            # Block-diagonal weights keep the N batch images independent.
            # TODO(synk): cast these dot inputs to bf16 (keep f32 accumulation)
            #             for v6e/v7x MXU rate once channel counts are real.
            acc = acc + jnp.dot(w_ref[t], shifted,
                                preferred_element_type=jnp.float32)
        return jnp.maximum(acc + bias, 0.0)

    a1 = conv3x3_bn_relu(pooled, w1_ref, bias_ref[0])
    a2 = conv3x3_bn_relu(a1, w2_ref, bias_ref[1])
    o_ref[...] = a2.astype(o_ref.dtype)


# -------------------------------- wrapper --------------------------------------

def _pool_selector(H, W, Ho, Wo):
    """(H*W, 4*P) 0/1 matrix: column phase*P + m selects the (phase)-corner of
    pooled pixel m from the flattened (H*W) row."""
    P = Ho * Wo
    m = jnp.arange(P)
    ho, wo = m // Wo, m % Wo
    src = jnp.concatenate([(2 * ho + p) * W + (2 * wo + q)
                           for p in range(2) for q in range(2)])        # (4P,)
    return (jnp.arange(H * W)[:, None] == src[None, :]).astype(jnp.float32)


def _shift_matrices(Ho, Wo):
    """(9, P, P) 0/1 matrices; matrix t = (kh*3+kw) maps flattened (ho,wo) to
    (ho+kh-1, wo+kw-1), with all-zero columns where the source is out of bounds
    (i.e. SAME zero padding is baked in)."""
    P = Ho * Wo
    m = jnp.arange(P)
    ho, wo = m // Wo, m % Wo
    rows = jnp.arange(P)[:, None]
    mats = []
    for kh in range(3):
        for kw in range(3):
            hs, ws = ho + kh - 1, wo + kw - 1
            valid = (hs >= 0) & (hs < Ho) & (ws >= 0) & (ws < Wo)
            src = jnp.where(valid, hs * Wo + ws, 0)
            mats.append(((rows == src[None, :]) & valid[None, :])
                        .astype(jnp.float32))
    return jnp.stack(mats)                                              # (9,P,P)


def _fold_conv_bn(w_hwio, conv_b, bn, n_batch, eps=1e-5):
    """Fold inference-mode BN scale into the conv weights, bias into one vector,
    and expand to block-diagonal per-batch, tap-major form."""
    cin, cout = w_hwio.shape[2], w_hwio.shape[3]
    s = bn["gamma"] / jnp.sqrt(bn["var"] + eps)                         # (Cout,)
    bias = (conv_b - bn["mean"]) * s + bn["beta"]                       # (Cout,)
    w_oc = jnp.transpose(w_hwio * s[None, None, None, :], (0, 1, 3, 2))
    w_oc = w_oc.reshape(9, cout, cin).astype(jnp.float32)               # (9,Cout,Cin)
    w_blk = jnp.einsum("nm,tij->tnimj",
                       jnp.eye(n_batch, dtype=jnp.float32), w_oc)
    w_blk = w_blk.reshape(9, n_batch * cout, n_batch * cin)
    bias_blk = jnp.tile(bias.astype(jnp.float32), (n_batch,)).reshape(
        n_batch * cout, 1)
    return w_blk, bias_blk


@jax.jit
def down_conv_forward(x_nchw, params):
    """Pallas implementation of DownConv.forward. Input/output are NCHW."""
    N, Cin, H, W = x_nchw.shape
    Ho, Wo = H // 2, W // 2
    if (H % 2) or (W % 2):                 # MaxPool2d(2,2) floors odd sizes
        x_nchw = x_nchw[:, :, :2 * Ho, :2 * Wo]
        H, W = 2 * Ho, 2 * Wo
    Cout = params["conv1_w"].shape[-1]
    P = Ho * Wo

    # FREE row-major reshape only -- no NCHW<->NHWC transpose HBM passes.
    x2d = x_nchw.reshape(N * Cin, H * W).astype(jnp.float32)

    psel = _pool_selector(H, W, Ho, Wo)
    shifts = _shift_matrices(Ho, Wo)
    w1b, b1 = _fold_conv_bn(params["conv1_w"], params["conv1_b"], params["bn1"], N)
    w2b, b2 = _fold_conv_bn(params["conv2_w"], params["conv2_b"], params["bn2"], N)
    bias = jnp.stack([b1, b2])                                          # (2,N*Cout,1)

    # TODO(synk): at realistic sizes add an H-tile grid axis marked "parallel"
    #             (shards across v7x's two TensorCores) and size tiles for its
    #             64 MiB VMEM (vmem_limit_bytes); here everything fits in one
    #             step (~1 MiB of VMEM including the constant shift matrices).
    out2d = pl.pallas_call(
        _down_conv_kernel,
        out_shape=jax.ShapeDtypeStruct((N * Cout, P), x_nchw.dtype),
        grid=(1,),
        in_specs=[
            pl.BlockSpec((N * Cin, H * W), lambda i: (0, 0)),
            pl.BlockSpec((H * W, 4 * P), lambda i: (0, 0)),
            pl.BlockSpec((9, P, P), lambda i: (0, 0, 0)),
            pl.BlockSpec((9, N * Cout, N * Cin), lambda i: (0, 0, 0)),
            pl.BlockSpec((9, N * Cout, N * Cout), lambda i: (0, 0, 0)),
            pl.BlockSpec((2, N * Cout, 1), lambda i: (0, 0, 0)),
        ],
        out_specs=pl.BlockSpec((N * Cout, P), lambda i: (0, 0)),
        compiler_params=pltpu.CompilerParams(
            dimension_semantics=("arbitrary",)),
    )(x2d, psel, shifts, w1b, w2b, bias)

    # FREE reshape back to NCHW: rows are (n, cout), lanes are (ho, wo).
    return out2d.reshape(N, Cout, Ho, Wo)


# --------------------------- params / pure-JAX reference ------------------------

def init_downconv_params(key, in_channels, out_channels):
    ks = jax.random.split(key, 12)

    def bn(k0, k1, k2, k3, c):
        return dict(
            gamma=1.0 + 0.1 * jax.random.normal(k0, (c,), jnp.float32),
            beta=0.1 * jax.random.normal(k1, (c,), jnp.float32),
            mean=0.1 * jax.random.normal(k2, (c,), jnp.float32),
            var=1.0 + 0.1 * jnp.abs(jax.random.normal(k3, (c,), jnp.float32)),
        )

    return dict(
        conv1_w=0.1 * jax.random.normal(ks[0], (3, 3, in_channels, out_channels), jnp.float32),
        conv1_b=0.1 * jax.random.normal(ks[1], (out_channels,), jnp.float32),
        bn1=bn(ks[2], ks[3], ks[4], ks[5], out_channels),
        conv2_w=0.1 * jax.random.normal(ks[6], (3, 3, out_channels, out_channels), jnp.float32),
        conv2_b=0.1 * jax.random.normal(ks[7], (out_channels,), jnp.float32),
        bn2=bn(ks[8], ks[9], ks[10], ks[11], out_channels),
    )


def down_conv_reference(x_nchw, params):
    x = jnp.transpose(x_nchw, (0, 2, 3, 1))
    N, H, W, C = x.shape
    x = x[:, :2 * (H // 2), :2 * (W // 2), :]
    x = lax.reduce_window(x, -jnp.inf, lax.max, (1, 2, 2, 1), (1, 2, 2, 1), "VALID")

    def cbr(x, w, b, bn):
        y = lax.conv_general_dilated(
            x, w, window_strides=(1, 1), padding="SAME",
            dimension_numbers=("NHWC", "HWIO", "NHWC"),
            precision=lax.Precision.HIGHEST) + b
        y = (y - bn["mean"]) / jnp.sqrt(bn["var"] + 1e-5) * bn["gamma"] + bn["beta"]
        return jnp.maximum(y, 0.0)

    x = cbr(x, params["conv1_w"], params["conv1_b"], params["bn1"])
    x = cbr(x, params["conv2_w"], params["conv2_b"], params["bn2"])
    return jnp.transpose(x, (0, 3, 1, 2))


# ------------------------------------ main --------------------------------------

if __name__ == "__main__":
    N, Cin, H, W = 2, 4, 16, 16
    Cout = 8

    key = jax.random.PRNGKey(0)
    kx, kp = jax.random.split(key)
    x = jax.random.normal(kx, (N, Cin, H, W), jnp.float32)    # NCHW like PyTorch
    params = init_downconv_params(kp, Cin, Cout)

    out = jax.block_until_ready(down_conv_forward(x, params))
    assert out.shape == (N, Cout, H // 2, W // 2), out.shape

    ref = jax.block_until_ready(down_conv_reference(x, params))
    err = float(jnp.max(jnp.abs(out - ref)))
    assert jnp.allclose(out, ref, rtol=1e-2, atol=1e-2), f"max abs err {err}"

    print("KERNEL_OK")
</pallas_src>

<mosaic_0001>
module attributes {stable_mosaic.version = 11 : i64} {
  func.func @_down_conv_kernel(%arg0: i32, %arg1: memref<8x256xf32, #tpu.memory_space<vmem>>, %arg2: memref<256x256xf32, #tpu.memory_space<vmem>>, %arg3: memref<9x64x64xf32, #tpu.memory_space<vmem>>, %arg4: memref<9x16x8xf32, #tpu.memory_space<vmem>>, %arg5: memref<9x16x16xf32, #tpu.memory_space<vmem>>, %arg6: memref<2x16x1xf32, #tpu.memory_space<vmem>>, %arg7: memref<16x64xf32, #tpu.memory_space<vmem>>) attributes {dimension_semantics = [#tpu.dimension_semantics<arbitrary>], iteration_bounds = array<i64: 1>, scalar_prefetch = 0 : i64, scratch_operands = 0 : i64, tpu.core_type = #tpu.core_type<tc>, window_params = [{pipeline_mode = #tpu.pipeline_mode<synchronous>, transform_indices = @transform_0, window_bounds = array<i64: 8, 256>}, {pipeline_mode = #tpu.pipeline_mode<synchronous>, transform_indices = @transform_1, window_bounds = array<i64: 256, 256>}, {pipeline_mode = #tpu.pipeline_mode<synchronous>, transform_indices = @transform_2, window_bounds = array<i64: 9, 64, 64>}, {pipeline_mode = #tpu.pipeline_mode<synchronous>, transform_indices = @transform_3, window_bounds = array<i64: 9, 16, 8>}, {pipeline_mode = #tpu.pipeline_mode<synchronous>, transform_indices = @transform_4, window_bounds = array<i64: 9, 16, 16>}, {pipeline_mode = #tpu.pipeline_mode<synchronous>, transform_indices = @transform_5, window_bounds = array<i64: 2, 16, 1>}, {pipeline_mode = #tpu.pipeline_mode<synchronous>, transform_indices = @transform_6, window_bounds = array<i64: 16, 64>}]} {
    %c0 = arith.constant 0 : index
    %c0_0 = arith.constant 0 : index
    %0 = vector.load %arg1[%c0, %c0_0] : memref<8x256xf32, #tpu.memory_space<vmem>>, vector<8x256xf32>
    %c0_1 = arith.constant 0 : index
    %c0_2 = arith.constant 0 : index
    %1 = vector.load %arg2[%c0_1, %c0_2] : memref<256x256xf32, #tpu.memory_space<vmem>>, vector<256x256xf32>
    %cst = arith.constant dense<0.000000e+00> : vector<8x256xf32>
    %2 = tpu.matmul %0, %1, %cst {dimension_numbers = #tpu.dot_dimension_numbers<[1], [0], [0], [1], [0, 0, 1, 1], [], []>} : vector<8x256xf32>, vector<256x256xf32>, vector<8x256xf32> -> vector<8x256xf32>
    %3 = vector.extract_strided_slice %2 {offsets = [0, 0], sizes = [8, 64], strides = [1, 1]} : vector<8x256xf32> to vector<8x64xf32>
    %4 = vector.extract_strided_slice %2 {offsets = [0, 64], sizes = [8, 64], strides = [1, 1]} : vector<8x256xf32> to vector<8x64xf32>
    %5 = arith.maximumf %3, %4 : vector<8x64xf32>
    %6 = vector.extract_strided_slice %2 {offsets = [0, 128], sizes = [8, 64], strides = [1, 1]} : vector<8x256xf32> to vector<8x64xf32>
    %7 = vector.extract_strided_slice %2 {offsets = [0, 192], sizes = [8, 64], strides = [1, 1]} : vector<8x256xf32> to vector<8x64xf32>
    %8 = arith.maximumf %6, %7 : vector<8x64xf32>
    %9 = arith.maximumf %5, %8 : vector<8x64xf32>
    %c0_3 = arith.constant 0 : index
    %c0_4 = arith.constant 0 : index
    %c0_5 = arith.constant 0 : index
    %10 = vector.load %arg6[%c0_3, %c0_4, %c0_5] : memref<2x16x1xf32, #tpu.memory_space<vmem>>, vector<1x16x1xf32>
    %11 = vector.shape_cast %10 : vector<1x16x1xf32> to vector<16x1xf32>
    %cst_6 = arith.constant 0.000000e+00 : f32
    %12 = vector.broadcast %cst_6 : f32 to vector<16x64xf32>
    %c0_7 = arith.constant 0 : index
    %c0_8 = arith.constant 0 : index
    %c0_9 = arith.constant 0 : index
    %13 = vector.load %arg3[%c0_7, %c0_8, %c0_9] : memref<9x64x64xf32, #tpu.memory_space<vmem>>, vector<1x64x64xf32>
    %14 = vector.shape_cast %13 : vector<1x64x64xf32> to vector<64x64xf32>
    %cst_10 = arith.constant dense<0.000000e+00> : vector<8x64xf32>
    %15 = tpu.matmul %9, %14, %cst_10 {dimension_numbers = #tpu.dot_dimension_numbers<[1], [0], [0], [1], [0, 0, 1, 1], [], []>} : vector<8x64xf32>, vector<64x64xf32>, vector<8x64xf32> -> vector<8x64xf32>
    %c0_11 = arith.constant 0 : index
    %c0_12 = arith.constant 0 : index
    %c0_13 = arith.constant 0 : index
    %16 = vector.load %arg4[%c0_11, %c0_12, %c0_13] : memref<9x16x8xf32, #tpu.memory_space<vmem>>, vector<1x16x8xf32>
    %17 = vector.shape_cast %16 : vector<1x16x8xf32> to vector<16x8xf32>
    %cst_14 = arith.constant dense<0.000000e+00> : vector<16x64xf32>
    %18 = tpu.matmul %17, %15, %cst_14 {dimension_numbers = #tpu.dot_dimension_numbers<[1], [0], [0], [1], [0, 0, 1, 1], [], []>} : vector<16x8xf32>, vector<8x64xf32>, vector<16x64xf32> -> vector<16x64xf32>
    %19 = arith.addf %12, %18 : vector<16x64xf32>
    %c1 = arith.constant 1 : index
    %c0_15 = arith.constant 0 : index
    %c0_16 = arith.constant 0 : index
    %20 = vector.load %arg3[%c1, %c0_15, %c0_16] : memref<9x64x64xf32, #tpu.memory_space<vmem>>, vector<1x64x64xf32>
    %21 = vector.shape_cast %20 : vector<1x64x64xf32> to vector<64x64xf32>
    %cst_17 = arith.constant dense<0.000000e+00> : vector<8x64xf32>
    %22 = tpu.matmul %9, %21, %cst_17 {dimension_numbers = #tpu.dot_dimension_numbers<[1], [0], [0], [1], [0, 0, 1, 1], [], []>} : vector<8x64xf32>, vector<64x64xf32>, vector<8x64xf32> -> vector<8x64xf32>
    %c1_18 = arith.constant 1 : index
    %c0_19 = arith.constant 0 : index
    %c0_20 = arith.constant 0 : index
    %23 = vector.load %arg4[%c1_18, %c0_19, %c0_20] : memref<9x16x8xf32, #tpu.memory_space<vmem>>, vector<1x16x8xf32>
    %24 = vector.shape_cast %23 : vector<1x16x8xf32> to vector<16x8xf32>
    %cst_21 = arith.constant dense<0.000000e+00> : vector<16x64xf32>
    %25 = tpu.matmul %24, %22, %cst_21 {dimension_numbers = #tpu.dot_dimension_numbers<[1], [0], [0], [1], [0, 0, 1, 1], [], []>} : vector<16x8xf32>, vector<8x64xf32>, vector<16x64xf32> -> vector<16x64xf32>
    %26 = arith.addf %19, %25 : vector<16x64xf32>
    %c2 = arith.constant 2 : index
    %c0_22 = arith.constant 0 : index
    %c0_23 = arith.constant 0 : index
    %27 = vector.load %arg3[%c2, %c0_22, %c0_23] : memref<9x64x64xf32, #tpu.memory_space<vmem>>, vector<1x64x64xf32>
    %28 = vector.shape_cast %27 : vector<1x64x64xf32> to vector<64x64xf32>
    %cst_24 = arith.constant dense<0.000000e+00> : vector<8x64xf32>
    %29 = tpu.matmul %9, %28, %cst_24 {dimension_numbers = #tpu.dot_dimension_numbers<[1], [0], [0], [1], [0, 0, 1, 1], [], []>} : vector<8x64xf32>, vector<64x64xf32>, vector<8x64xf32> -> vector<8x64xf32>
    %c2_25 = arith.constant 2 : index
    %c0_26 = arith.constant 0 : index
    %c0_27 = arith.constant 0 : index
    %30 = vector.load %arg4[%c2_25, %c0_26, %c0_27] : memref<9x16x8xf32, #tpu.memory_space<vmem>>, vector<1x16x8xf32>
    %31 = vector.shape_cast %30 : vector<1x16x8xf32> to vector<16x8xf32>
    %cst_28 = arith.constant dense<0.000000e+00> : vector<16x64xf32>
    %32 = tpu.matmul %31, %29, %cst_28 {dimension_numbers = #tpu.dot_dimension_numbers<[1], [0], [0], [1], [0, 0, 1, 1], [], []>} : vector<16x8xf32>, vector<8x64xf32>, vector<16x64xf32> -> vector<16x64xf32>
    %33 = arith.addf %26, %32 : vector<16x64xf32>
    %c3 = arith.constant 3 : index
    %c0_29 = arith.constant 0 : index
    %c0_30 = arith.constant 0 : index
    %34 = vector.load %arg3[%c3, %c0_29, %c0_30] : memref<9x64x64xf32, #tpu.memory_space<vmem>>, vector<1x64x64xf32>
    %35 = vector.shape_cast %34 : vector<1x64x64xf32> to vector<64x64xf32>
    %cst_31 = arith.constant dense<0.000000e+00> : vector<8x64xf32>
    %36 = tpu.matmul %9, %35, %cst_31 {dimension_numbers = #tpu.dot_dimension_numbers<[1], [0], [0], [1], [0, 0, 1, 1], [], []>} : vector<8x64xf32>, vector<64x64xf32>, vector<8x64xf32> -> vector<8x64xf32>
    %c3_32 = arith.constant 3 : index
    %c0_33 = arith.constant 0 : index
    %c0_34 = arith.constant 0 : index
    %37 = vector.load %arg4[%c3_32, %c0_33, %c0_34] : memref<9x16x8xf32, #tpu.memory_space<vmem>>, vector<1x16x8xf32>
    %38 = vector.shape_cast %37 : vector<1x16x8xf32> to vector<16x8xf32>
    %cst_35 = arith.constant dense<0.000000e+00> : vector<16x64xf32>
    %39 = tpu.matmul %38, %36, %cst_35 {dimension_numbers = #tpu.dot_dimension_numbers<[1], [0], [0], [1], [0, 0, 1, 1], [], []>} : vector<16x8xf32>, vector<8x64xf32>, vector<16x64xf32> -> vector<16x64xf32>
    %40 = arith.addf %33, %39 : vector<16x64xf32>
    %c4 = arith.constant 4 : index
    %c0_36 = arith.constant 0 : index
    %c0_37 = arith.constant 0 : index
    %41 = vector.load %arg3[%c4, %c0_36, %c0_37] : memref<9x64x64xf32, #tpu.memory_space<vmem>>, vector<1x64x64xf32>
    %42 = vector.shape_cast %41 : vector<1x64x64xf32> to vector<64x64xf32>
    %cst_38 = arith.constant dense<0.000000e+00> : vector<8x64xf32>
    %43 = tpu.matmul %9, %42, %cst_38 {dimension_numbers = #tpu.dot_dimension_numbers<[1], [0], [0], [1], [0, 0, 1, 1], [], []>} : vector<8x64xf32>, vector<64x64xf32>, vector<8x64xf32> -> vector<8x64xf32>
    %c4_39 = arith.constant 4 : index
    %c0_40 = arith.constant 0 : index
    %c0_41 = arith.constant 0 : index
    %44 = vector.load %arg4[%c4_39, %c0_40, %c0_41] : memref<9x16x8xf32, #tpu.memory_space<vmem>>, vector<1x16x8xf32>
    %45 = vector.shape_cast %44 : vector<1x16x8xf32> to vector<16x8xf32>
    %cst_42 = arith.constant dense<0.000000e+00> : vector<16x64xf32>
    %46 = tpu.matmul %45, %43, %cst_42 {dimension_numbers = #tpu.dot_dimension_numbers<[1], [0], [0], [1], [0, 0, 1, 1], [], []>} : vector<16x8xf32>, vector<8x64xf32>, vector<16x64xf32> -> vector<16x64xf32>
    %47 = arith.addf %40, %46 : vector<16x64xf32>
    %c5 = arith.constant 5 : index
    %c0_43 = arith.constant 0 : index
    %c0_44 = arith.constant 0 : index
    %48 = vector.load %arg3[%c5, %c0_43, %c0_44] : memref<9x64x64xf32, #tpu.memory_space<vmem>>, vector<1x64x64xf32>
    %49 = vector.shape_cast %48 : vector<1x64x64xf32> to vector<64x64xf32>
    %cst_45 = arith.constant dense<0.000000e+00> : vector<8x64xf32>
    %50 = tpu.matmul %9, %49, %cst_45 {dimension_numbers = #tpu.dot_dimension_numbers<[1], [0], [0], [1], [0, 0, 1, 1], [], []>} : vector<8x64xf32>, vector<64x64xf32>, vector<8x64xf32> -> vector<8x64xf32>
    %c5_46 = arith.constant 5 : index
    %c0_47 = arith.constant 0 : index
    %c0_48 = arith.constant 0 : index
    %51 = vector.load %arg4[%c5_46, %c0_47, %c0_48] : memref<9x16x8xf32, #tpu.memory_space<vmem>>, vector<1x16x8xf32>
    %52 = vector.shape_cast %51 : vector<1x16x8xf32> to vector<16x8xf32>
    %cst_49 = arith.constant dense<0.000000e+00> : vector<16x64xf32>
    %53 = tpu.matmul %52, %50, %cst_49 {dimension_numbers = #tpu.dot_dimension_numbers<[1], [0], [0], [1], [0, 0, 1, 1], [], []>} : vector<16x8xf32>, vector<8x64xf32>, vector<16x64xf32> -> vector<16x64xf32>
    %54 = arith.addf %47, %53 : vector<16x64xf32>
    %c6 = arith.constant 6 : index
    %c0_50 = arith.constant 0 : index
    %c0_51 = arith.constant 0 : index
    %55 = vector.load %arg3[%c6, %c0_50, %c0_51] : memref<9x64x64xf32, #tpu.memory_space<vmem>>, vector<1x64x64xf32>
    %56 = vector.shape_cast %55 : vector<1x64x64xf32> to vector<64x64xf32>
    %cst_52 = arith.constant dense<0.000000e+00> : vector<8x64xf32>
    %57 = tpu.matmul %9, %56, %cst_52 {dimension_numbers = #tpu.dot_dimension_numbers<[1], [0], [0], [1], [0, 0, 1, 1], [], []>} : vector<8x64xf32>, vector<64x64xf32>, vector<8x64xf32> -> vector<8x64xf32>
    %c6_53 = arith.constant 6 : index
    %c0_54 = arith.constant 0 : index
    %c0_55 = arith.constant 0 : index
    %58 = vector.load %arg4[%c6_53, %c0_54, %c0_55] : memref<9x16x8xf32, #tpu.memory_space<vmem>>, vector<1x16x8xf32>
    %59 = vector.shape_cast %58 : vector<1x16x8xf32> to vector<16x8xf32>
    %cst_56 = arith.constant dense<0.000000e+00> : vector<16x64xf32>
    %60 = tpu.matmul %59, %57, %cst_56 {dimension_numbers = #tpu.dot_dimension_numbers<[1], [0], [0], [1], [0, 0, 1, 1], [], []>} : vector<16x8xf32>, vector<8x64xf32>, vector<16x64xf32> -> vector<16x64xf32>
    %61 = arith.addf %54, %60 : vector<16x64xf32>
    %c7 = arith.constant 7 : index
    %c0_57 = arith.constant 0 : index
    %c0_58 = arith.constant 0 : index
    %62 = vector.load %arg3[%c7, %c0_57, %c0_58] : memref<9x64x64xf32, #tpu.memory_space<vmem>>, vector<1x64x64xf32>
    %63 = vector.shape_cast %62 : vector<1x64x64xf32> to vector<64x64xf32>
    %cst_59 = arith.constant dense<0.000000e+00> : vector<8x64xf32>
    %64 = tpu.matmul %9, %63, %cst_59 {dimension_numbers = #tpu.dot_dimension_numbers<[1], [0], [0], [1], [0, 0, 1, 1], [], []>} : vector<8x64xf32>, vector<64x64xf32>, vector<8x64xf32> -> vector<8x64xf32>
    %c7_60 = arith.constant 7 : index
    %c0_61 = arith.constant 0 : index
    %c0_62 = arith.constant 0 : index
    %65 = vector.load %arg4[%c7_60, %c0_61, %c0_62] : memref<9x16x8xf32, #tpu.memory_space<vmem>>, vector<1x16x8xf32>
    %66 = vector.shape_cast %65 : vector<1x16x8xf32> to vector<16x8xf32>
    %cst_63 = arith.constant dense<0.000000e+00> : vector<16x64xf32>
    %67 = tpu.matmul %66, %64, %cst_63 {dimension_numbers = #tpu.dot_dimension_numbers<[1], [0], [0], [1], [0, 0, 1, 1], [], []>} : vector<16x8xf32>, vector<8x64xf32>, vector<16x64xf32> -> vector<16x64xf32>
    %68 = arith.addf %61, %67 : vector<16x64xf32>
    %c8 = arith.constant 8 : index
    %c0_64 = arith.constant 0 : index
    %c0_65 = arith.constant 0 : index
    %69 = vector.load %arg3[%c8, %c0_64, %c0_65] : memref<9x64x64xf32, #tpu.memory_space<vmem>>, vector<1x64x64xf32>
    %70 = vector.shape_cast %69 : vector<1x64x64xf32> to vector<64x64xf32>
    %cst_66 = arith.constant dense<0.000000e+00> : vector<8x64xf32>
    %71 = tpu.matmul %9, %70, %cst_66 {dimension_numbers = #tpu.dot_dimension_numbers<[1], [0], [0], [1], [0, 0, 1, 1], [], []>} : vector<8x64xf32>, vector<64x64xf32>, vector<8x64xf32> -> vector<8x64xf32>
    %c8_67 = arith.constant 8 : index
    %c0_68 = arith.constant 0 : index
    %c0_69 = arith.constant 0 : index
    %72 = vector.load %arg4[%c8_67, %c0_68, %c0_69] : memref<9x16x8xf32, #tpu.memory_space<vmem>>, vector<1x16x8xf32>
    %73 = vector.shape_cast %72 : vector<1x16x8xf32> to vector<16x8xf32>
    %cst_70 = arith.constant dense<0.000000e+00> : vector<16x64xf32>
    %74 = tpu.matmul %73, %71, %cst_70 {dimension_numbers = #tpu.dot_dimension_numbers<[1], [0], [0], [1], [0, 0, 1, 1], [], []>} : vector<16x8xf32>, vector<8x64xf32>, vector<16x64xf32> -> vector<16x64xf32>
    %75 = arith.addf %68, %74 : vector<16x64xf32>
    %76 = vector.broadcast %11 : vector<16x1xf32> to vector<16x64xf32>
    %77 = arith.addf %75, %76 : vector<16x64xf32>
    %cst_71 = arith.constant 0.000000e+00 : f32
    %78 = vector.broadcast %cst_71 : f32 to vector<16x64xf32>
    %79 = arith.maximumf %77, %78 : vector<16x64xf32>
    %c1_72 = arith.constant 1 : index
    %c0_73 = arith.constant 0 : index
    %c0_74 = arith.constant 0 : index
    %80 = vector.load %arg6[%c1_72, %c0_73, %c0_74] : memref<2x16x1xf32, #tpu.memory_space<vmem>>, vector<1x16x1xf32>
    %81 = vector.shape_cast %80 : vector<1x16x1xf32> to vector<16x1xf32>
    %cst_75 = arith.constant 0.000000e+00 : f32
    %82 = vector.broadcast %cst_75 : f32 to vector<16x64xf32>
    %c0_76 = arith.constant 0 : index
    %c0_77 = arith.constant 0 : index
    %c0_78 = arith.constant 0 : index
    %83 = vector.load %arg3[%c0_76, %c0_77, %c0_78] : memref<9x64x64xf32, #tpu.memory_space<vmem>>, vector<1x64x64xf32>
    %84 = vector.shape_cast %83 : vector<1x64x64xf32> to vector<64x64xf32>
    %cst_79 = arith.constant dense<0.000000e+00> : vector<16x64xf32>
    %85 = tpu.matmul %79, %84, %cst_79 {dimension_numbers = #tpu.dot_dimension_numbers<[1], [0], [0], [1], [0, 0, 1, 1], [], []>} : vector<16x64xf32>, vector<64x64xf32>, vector<16x64xf32> -> vector<16x64xf32>
    %c0_80 = arith.constant 0 : index
    %c0_81 = arith.constant 0 : index
    %c0_82 = arith.constant 0 : index
    %86 = vector.load %arg5[%c0_80, %c0_81, %c0_82] : memref<9x16x16xf32, #tpu.memory_space<vmem>>, vector<1x16x16xf32>
    %87 = vector.shape_cast %86 : vector<1x16x16xf32> to vector<16x16xf32>
    %cst_83 = arith.constant dense<0.000000e+00> : vector<16x64xf32>
    %88 = tpu.matmul %87, %85, %cst_83 {dimension_numbers = #tpu.dot_dimension_numbers<[1], [0], [0], [1], [0, 0, 1, 1], [], []>} : vector<16x16xf32>, vector<16x64xf32>, vector<16x64xf32> -> vector<16x64xf32>
    %89 = arith.addf %82, %88 : vector<16x64xf32>
    %c1_84 = arith.constant 1 : index
    %c0_85 = arith.constant 0 : index
    %c0_86 = arith.constant 0 : index
    %90 = vector.load %arg3[%c1_84, %c0_85, %c0_86] : memref<9x64x64xf32, #tpu.memory_space<vmem>>, vector<1x64x64xf32>
    %91 = vector.shape_cast %90 : vector<1x64x64xf32> to vector<64x64xf32>
    %cst_87 = arith.constant dense<0.000000e+00> : vector<16x64xf32>
    %92 = tpu.matmul %79, %91, %cst_87 {dimension_numbers = #tpu.dot_dimension_numbers<[1], [0], [0], [1], [0, 0, 1, 1], [], []>} : vector<16x64xf32>, vector<64x64xf32>, vector<16x64xf32> -> vector<16x64xf32>
    %c1_88 = arith.constant 1 : index
    %c0_89 = arith.constant 0 : index
    %c0_90 = arith.constant 0 : index
    %93 = vector.load %arg5[%c1_88, %c0_89, %c0_90] : memref<9x16x16xf32, #tpu.memory_space<vmem>>, vector<1x16x16xf32>
    %94 = vector.shape_cast %93 : vector<1x16x16xf32> to vector<16x16xf32>
    %cst_91 = arith.constant dense<0.000000e+00> : vector<16x64xf32>
    %95 = tpu.matmul %94, %92, %cst_91 {dimension_numbers = #tpu.dot_dimension_numbers<[1], [0], [0], [1], [0, 0, 1, 1], [], []>} : vector<16x16xf32>, vector<16x64xf32>, vector<16x64xf32> -> vector<16x64xf32>
    %96 = arith.addf %89, %95 : vector<16x64xf32>
    %c2_92 = arith.constant 2 : index
    %c0_93 = arith.constant 0 : index
    %c0_94 = arith.constant 0 : index
    %97 = vector.load %arg3[%c2_92, %c0_93, %c0_94] : memref<9x64x64xf32, #tpu.memory_space<vmem>>, vector<1x64x64xf32>
    %98 = vector.shape_cast %97 : vector<1x64x64xf32> to vector<64x64xf32>
    %cst_95 = arith.constant dense<0.000000e+00> : vector<16x64xf32>
    %99 = tpu.matmul %79, %98, %cst_95 {dimension_numbers = #tpu.dot_dimension_numbers<[1], [0], [0], [1], [0, 0, 1, 1], [], []>} : vector<16x64xf32>, vector<64x64xf32>, vector<16x64xf32> -> vector<16x64xf32>
    %c2_96 = arith.constant 2 : index
    %c0_97 = arith.constant 0 : index
    %c0_98 = arith.constant 0 : index
    %100 = vector.load %arg5[%c2_96, %c0_97, %c0_98] : memref<9x16x16xf32, #tpu.memory_space<vmem>>, vector<1x16x16xf32>
    %101 = vector.shape_cast %100 : vector<1x16x16xf32> to vector<16x16xf32>
    %cst_99 = arith.constant dense<0.000000e+00> : vector<16x64xf32>
    %102 = tpu.matmul %101, %99, %cst_99 {dimension_numbers = #tpu.dot_dimension_numbers<[1], [0], [0], [1], [0, 0, 1, 1], [], []>} : vector<16x16xf32>, vector<16x64xf32>, vector<16x64xf32> -> vector<16x64xf32>
    %103 = arith.addf %96, %102 : vector<16x64xf32>
    %c3_100 = arith.constant 3 : index
    %c0_101 = arith.constant 0 : index
    %c0_102 = arith.constant 0 : index
    %104 = vector.load %arg3[%c3_100, %c0_101, %c0_102] : memref<9x64x64xf32, #tpu.memory_space<vmem>>, vector<1x64x64xf32>
    %105 = vector.shape_cast %104 : vector<1x64x64xf32> to vector<64x64xf32>
    %cst_103 = arith.constant dense<0.000000e+00> : vector<16x64xf32>
    %106 = tpu.matmul %79, %105, %cst_103 {dimension_numbers = #tpu.dot_dimension_numbers<[1], [0], [0], [1], [0, 0, 1, 1], [], []>} : vector<16x64xf32>, vector<64x64xf32>, vector<16x64xf32> -> vector<16x64xf32>
    %c3_104 = arith.constant 3 : index
    %c0_105 = arith.constant 0 : index
    %c0_106 = arith.constant 0 : index
    %107 = vector.load %arg5[%c3_104, %c0_105, %c0_106] : memref<9x16x16xf32, #tpu.memory_space<vmem>>, vector<1x16x16xf32>
    %108 = vector.shape_cast %107 : vector<1x16x16xf32> to vector<16x16xf32>
    %cst_107 = arith.constant dense<0.000000e+00> : vector<16x64xf32>
    %109 = tpu.matmul %108, %106, %cst_107 {dimension_numbers = #tpu.dot_dimension_numbers<[1], [0], [0], [1], [0, 0, 1, 1], [], []>} : vector<16x16xf32>, vector<16x64xf32>, vector<16x64xf32> -> vector<16x64xf32>
    %110 = arith.addf %103, %109 : vector<16x64xf32>
    %c4_108 = arith.constant 4 : index
    %c0_109 = arith.constant 0 : index
    %c0_110 = arith.constant 0 : index
    %111 = vector.load %arg3[%c4_108, %c0_109, %c0_110] : memref<9x64x64xf32, #tpu.memory_space<vmem>>, vector<1x64x64xf32>
    %112 = vector.shape_cast %111 : vector<1x64x64xf32> to vector<64x64xf32>
    %cst_111 = arith.constant dense<0.000000e+00> : vector<16x64xf32>
    %113 = tpu.matmul %79, %112, %cst_111 {dimension_numbers = #tpu.dot_dimension_numbers<[1], [0], [0], [1], [0, 0, 1, 1], [], []>} : vector<16x64xf32>, vector<64x64xf32>, vector<16x64xf32> -> vector<16x64xf32>
    %c4_112 = arith.constant 4 : index
    %c0_113 = arith.constant 0 : index
    %c0_114 = arith.constant 0 : index
    %114 = vector.load %arg5[%c4_112, %c0_113, %c0_114] : memref<9x16x16xf32, #tpu.memory_space<vmem>>, vector<1x16x16xf32>
    %115 = vector.shape_cast %114 : vector<1x16x16xf32> to vector<16x16xf32>
    %cst_115 = arith.constant dense<0.000000e+00> : vector<16x64xf32>
    %116 = tpu.matmul %115, %113, %cst_115 {dimension_numbers = #tpu.dot_dimension_numbers<[1], [0], [0], [1], [0, 0, 1, 1], [], []>} : vector<16x16xf32>, vector<16x64xf32>, vector<16x64xf32> -> vector<16x64xf32>
    %117 = arith.addf %110, %116 : vector<16x64xf32>
    %c5_116 = arith.constant 5 : index
    %c0_117 = arith.constant 0 : index
    %c0_118 = arith.constant 0 : index
    %118 = vector.load %arg3[%c5_116, %c0_117, %c0_118] : memref<9x64x64xf32, #tpu.memory_space<vmem>>, vector<1x64x64xf32>
    %119 = vector.shape_cast %118 : vector<1x64x64xf32> to vector<64x64xf32>
    %cst_119 = arith.constant dense<0.000000e+00> : vector<16x64xf32>
    %120 = tpu.matmul %79, %119, %cst_119 {dimension_numbers = #tpu.dot_dimension_numbers<[1], [0], [0], [1], [0, 0, 1, 1], [], []>} : vector<16x64xf32>, vector<64x64xf32>, vector<16x64xf32> -> vector<16x64xf32>
    %c5_120 = arith.constant 5 : index
    %c0_121 = arith.constant 0 : index
    %c0_122 = arith.constant 0 : index
    %121 = vector.load %arg5[%c5_120, %c0_121, %c0_122] : memref<9x16x16xf32, #tpu.memory_space<vmem>>, vector<1x16x16xf32>
    %122 = vector.shape_cast %121 : vector<1x16x16xf32> to vector<16x16xf32>
    %cst_123 = arith.constant dense<0.000000e+00> : vector<16x64xf32>
    %123 = tpu.matmul %122, %120, %cst_123 {dimension_numbers = #tpu.dot_dimension_numbers<[1], [0], [0], [1], [0, 0, 1, 1], [], []>} : vector<16x16xf32>, vector<16x64xf32>, vector<16x64xf32> -> vector<16x64xf32>
    %124 = arith.addf %117, %123 : vector<16x64xf32>
    %c6_124 = arith.constant 6 : index
    %c0_125 = arith.constant 0 : index
    %c0_126 = arith.constant 0 : index
    %125 = vector.load %arg3[%c6_124, %c0_125, %c0_126] : memref<9x64x64xf32, #tpu.memory_space<vmem>>, vector<1x64x64xf32>
    %126 = vector.shape_cast %125 : vector<1x64x64xf32> to vector<64x64xf32>
    %cst_127 = arith.constant dense<0.000000e+00> : vector<16x64xf32>
    %127 = tpu.matmul %79, %126, %cst_127 {dimension_numbers = #tpu.dot_dimension_numbers<[1], [0], [0], [1], [0, 0, 1, 1], [], []>} : vector<16x64xf32>, vector<64x64xf32>, vector<16x64xf32> -> vector<16x64xf32>
    %c6_128 = arith.constant 6 : index
    %c0_129 = arith.constant 0 : index
    %c0_130 = arith.constant 0 : index
    %128 = vector.load %arg5[%c6_128, %c0_129, %c0_130] : memref<9x16x16xf32, #tpu.memory_space<vmem>>, vector<1x16x16xf32>
    %129 = vector.shape_cast %128 : vector<1x16x16xf32> to vector<16x16xf32>
    %cst_131 = arith.constant dense<0.000000e+00> : vector<16x64xf32>
    %130 = tpu.matmul %129, %127, %cst_131 {dimension_numbers = #tpu.dot_dimension_numbers<[1], [0], [0], [1], [0, 0, 1, 1], [], []>} : vector<16x16xf32>, vector<16x64xf32>, vector<16x64xf32> -> vector<16x64xf32>
    %131 = arith.addf %124, %130 : vector<16x64xf32>
    %c7_132 = arith.constant 7 : index
    %c0_133 = arith.constant 0 : index
    %c0_134 = arith.constant 0 : index
    %132 = vector.load %arg3[%c7_132, %c0_133, %c0_134] : memref<9x64x64xf32, #tpu.memory_space<vmem>>, vector<1x64x64xf32>
    %133 = vector.shape_cast %132 : vector<1x64x64xf32> to vector<64x64xf32>
    %cst_135 = arith.constant dense<0.000000e+00> : vector<16x64xf32>
    %134 = tpu.matmul %79, %133, %cst_135 {dimension_numbers = #tpu.dot_dimension_numbers<[1], [0], [0], [1], [0, 0, 1, 1], [], []>} : vector<16x64xf32>, vector<64x64xf32>, vector<16x64xf32> -> vector<16x64xf32>
    %c7_136 = arith.constant 7 : index
    %c0_137 = arith.constant 0 : index
    %c0_138 = arith.constant 0 : index
    %135 = vector.load %arg5[%c7_136, %c0_137, %c0_138] : memref<9x16x16xf32, #tpu.memory_space<vmem>>, vector<1x16x16xf32>
    %136 = vector.shape_cast %135 : vector<1x16x16xf32> to vector<16x16xf32>
    %cst_139 = arith.constant dense<0.000000e+00> : vector<16x64xf32>
    %137 = tpu.matmul %136, %134, %cst_139 {dimension_numbers = #tpu.dot_dimension_numbers<[1], [0], [0], [1], [0, 0, 1, 1], [], []>} : vector<16x16xf32>, vector<16x64xf32>, vector<16x64xf32> -> vector<16x64xf32>
    %138 = arith.addf %131, %137 : vector<16x64xf32>
    %c8_140 = arith.constant 8 : index
    %c0_141 = arith.constant 0 : index
    %c0_142 = arith.constant 0 : index
    %139 = vector.load %arg3[%c8_140, %c0_141, %c0_142] : memref<9x64x64xf32, #tpu.memory_space<vmem>>, vector<1x64x64xf32>
    %140 = vector.shape_cast %139 : vector<1x64x64xf32> to vector<64x64xf32>
    %cst_143 = arith.constant dense<0.000000e+00> : vector<16x64xf32>
    %141 = tpu.matmul %79, %140, %cst_143 {dimension_numbers = #tpu.dot_dimension_numbers<[1], [0], [0], [1], [0, 0, 1, 1], [], []>} : vector<16x64xf32>, vector<64x64xf32>, vector<16x64xf32> -> vector<16x64xf32>
    %c8_144 = arith.constant 8 : index
    %c0_145 = arith.constant 0 : index
    %c0_146 = arith.constant 0 : index
    %142 = vector.load %arg5[%c8_144, %c0_145, %c0_146] : memref<9x16x16xf32, #tpu.memory_space<vmem>>, vector<1x16x16xf32>
    %143 = vector.shape_cast %142 : vector<1x16x16xf32> to vector<16x16xf32>
    %cst_147 = arith.constant dense<0.000000e+00> : vector<16x64xf32>
    %144 = tpu.matmul %143, %141, %cst_147 {dimension_numbers = #tpu.dot_dimension_numbers<[1], [0], [0], [1], [0, 0, 1, 1], [], []>} : vector<16x16xf32>, vector<16x64xf32>, vector<16x64xf32> -> vector<16x64xf32>
    %145 = arith.addf %138, %144 : vector<16x64xf32>
    %146 = vector.broadcast %81 : vector<16x1xf32> to vector<16x64xf32>
    %147 = arith.addf %145, %146 : vector<16x64xf32>
    %cst_148 = arith.constant 0.000000e+00 : f32
    %148 = vector.broadcast %cst_148 : f32 to vector<16x64xf32>
    %149 = arith.maximumf %147, %148 : vector<16x64xf32>
    %c0_149 = arith.constant 0 : index
    %c0_150 = arith.constant 0 : index
    %150 = vector.load %arg7[%c0_149, %c0_150] : memref<16x64xf32, #tpu.memory_space<vmem>>, vector<16x64xf32>
    tpu.vector_store %arg7[%c0_149, %c0_150], %149 {strides = array<i32>} : memref<16x64xf32, #tpu.memory_space<vmem>>, vector<16x64xf32>,
    return
  }
  func.func @transform_0(%arg0: i32) -> (i32, i32) {
    %c0_i32 = arith.constant 0 : i32
    %c0_i32_0 = arith.constant 0 : i32
    %c0_i32_1 = arith.constant 0 : i32
    return %c0_i32, %c0_i32_0 : i32, i32
  }
  func.func @transform_1(%arg0: i32) -> (i32, i32) {
    %c0_i32 = arith.constant 0 : i32
    %c0_i32_0 = arith.constant 0 : i32
    %c0_i32_1 = arith.constant 0 : i32
    return %c0_i32, %c0_i32_0 : i32, i32
  }
  func.func @transform_2(%arg0: i32) -> (i32, i32, i32) {
    %c0_i32 = arith.constant 0 : i32
    %c0_i32_0 = arith.constant 0 : i32
    %c0_i32_1 = arith.constant 0 : i32
    %c0_i32_2 = arith.constant 0 : i32
    return %c0_i32, %c0_i32_0, %c0_i32_1 : i32, i32, i32
  }
  func.func @transform_3(%arg0: i32) -> (i32, i32, i32) {
    %c0_i32 = arith.constant 0 : i32
    %c0_i32_0 = arith.constant 0 : i32
    %c0_i32_1 = arith.constant 0 : i32
    %c0_i32_2 = arith.constant 0 : i32
    return %c0_i32, %c0_i32_0, %c0_i32_1 : i32, i32, i32
  }
  func.func @transform_4(%arg0: i32) -> (i32, i32, i32) {
    %c0_i32 = arith.constant 0 : i32
    %c0_i32_0 = arith.constant 0 : i32
    %c0_i32_1 = arith.constant 0 : i32
    %c0_i32_2 = arith.constant 0 : i32
    return %c0_i32, %c0_i32_0, %c0_i32_1 : i32, i32, i32
  }
  func.func @transform_5(%arg0: i32) -> (i32, i32, i32) {
    %c0_i32 = arith.constant 0 : i32
    %c0_i32_0 = arith.constant 0 : i32
    %c0_i32_1 = arith.constant 0 : i32
    %c0_i32_2 = arith.constant 0 : i32
    return %c0_i32, %c0_i32_0, %c0_i32_1 : i32, i32, i32
  }
  func.func @transform_6(%arg0: i32) -> (i32, i32) {
    %c0_i32 = arith.constant 0 : i32
    %c0_i32_0 = arith.constant 0 : i32
    %c0_i32_1 = arith.constant 0 : i32
    return %c0_i32, %c0_i32_0 : i32, i32
  }
}

</mosaic_0001>

<bundles_post_ra>
// kernel: tile.13
= control target key start
LH: loop header
LB: loop body
LE: loop exit
PB: predicated region body
PF: predicated region fallthrough
CT: control target
= control target key end

     0   :  { %s22_s0 = inlined_call_operand.vmem [shape: f32[8], index: 0, kind: input, shape index: {}]   ;;  %s23_s1 = inlined_call_operand.vmem [shape: f32[2,8], index: 1, kind: output, shape index: {}]  }
   0x1   :  { %v4_v0 = vld [vmem:[%s22_s0] ss:$0 sm:$0xff] }
   0x2   :  { %5 = vst [vmem:[%s23_s1] sm:$0x3] %v4_v0 }

// kernel: tile.1
= control target key start
LH: loop header
LB: loop body
LE: loop exit
PB: predicated region body
PF: predicated region fallthrough
CT: control target
= control target key end

     0   :  { %s66_s8 = smov 125   ;;  %vm7_vm0 = vcmask 7168   ;;  %s67_s11 = smov 126   ;;  %s117_s0 = inlined_call_operand.vmem [shape: f32[2,8], index: 0, kind: input, shape index: {}]   ;;  %s118_s1 = inlined_call_operand.vmem [shape: f32[1,16,1], index: 1, kind: output, shape index: {}]  }
   0x1   :  { %v4_v0 = vld [vmem:[%s117_s0] sm:$0x3]  ;;  %s65_s0 = smov 127   ;;  %s68_s12 = smov 124  }
   0x2   :  { %5 = vst [vmem:[#allocation0] sm:$0x3] %v4_v0  ;;  %s69_s13 = smov 123   ;;  %s70_s14 = smov 122  }
   0x3   :  { %s71_s15 = smov 121  }
   0x9   :  { %v9_v1 = vld [vmem:[#allocation0] sm:$0x3]  }
   0xa   :  { %v21_v2 = vld [vmem:[#allocation0] sm:$0x3]   ;;  %10 = vrot.lane.b32.xlu0 %v9_v1, %s65_s0 }
   0xb   :  { %22 = vrot.lane.b32.xlu1 %v21_v2, %s66_s8  ;;  %v15_v3 = vld [vmem:[#allocation0] sm:$0x3]  }
   0xc   :  { %v27_v4 = vld [vmem:[#allocation0] sm:$0x3]  }
   0xd   :  { %v6_v5 = vld [vmem:[#allocation0] sm:$0x3]  }
   0xe   :  { %8 = vst.msk [vmem:[%s118_s1] ss:$8 sm:$0x3] %vm7_vm0, %v6_v5   ;;  %16 = vrot.lane.b32.xlu0 %v15_v3, %s67_s11  ;;  %v33_v6 = vld [vmem:[#allocation0] sm:$0x3]  }
   0xf   :  { %28 = vrot.lane.b32.xlu1 %v27_v4, %s68_s12  ;;  %v39_v7 = vld [vmem:[#allocation0] sm:$0x3]  }
  0x10   :  { %v45_v8 = vld [vmem:[#allocation0] sm:$0x3]  }
  0x12   :  { %34 = vrot.lane.b32.xlu0 %v33_v6, %s69_s13 }
  0x13   :  { %40 = vrot.lane.b32.xlu1 %v39_v7, %s70_s14 }
  0x16   :  { %46 = vrot.lane.b32.xlu0 %v45_v8, %s71_s15 }
  0x7c   :  { %v11_v9 = vpop.permute.xlu0 %10  }
  0x7d   :  { %v23_v10 = vpop.permute.xlu1 %22   ;;  %51 = vst.msk [vmem:[%s118_s1 + $0x1] ss:$8 sm:$0x3] %vm7_vm0, %v11_v9  }
  0x7e   :  { %53 = vst.msk [vmem:[%s118_s1 + $0x3] ss:$8 sm:$0x3] %vm7_vm0, %v23_v10  }
  0x80   :  { %v17_v11 = vpop.permute.xlu0 %16  }
  0x81   :  { %v29_v12 = vpop.permute.xlu1 %28   ;;  %52 = vst.msk [vmem:[%s118_s1 + $0x2] ss:$8 sm:$0x3] %vm7_vm0, %v17_v11  }
  0x82   :  { %54 = vst.msk [vmem:[%s118_s1 + $0x4] ss:$8 sm:$0x3] %vm7_vm0, %v29_v12  }
  0x84   :  { %v35_v13 = vpop.permute.xlu0 %34  }
  0x85   :  { %v41_v14 = vpop.permute.xlu1 %40   ;;  %55 = vst.msk [vmem:[%s118_s1 + $0x5] ss:$8 sm:$0x3] %vm7_vm0, %v35_v13  }
  0x86   :  { %56 = vst.msk [vmem:[%s118_s1 + $0x6] ss:$8 sm:$0x3] %vm7_vm0, %v41_v14  }
  0x88   :  { %v47_v15 = vpop.permute.xlu0 %46  }
  0x89   :  { %57 = vst.msk [vmem:[%s118_s1 + $0x7] ss:$8 sm:$0x3] %vm7_vm0, %v47_v15  }

// kernel: down_conv_forward.1
= control target key start
LH: loop header
LB: loop body
LE: loop exit
PB: predicated region body
PF: predicated region fallthrough
CT: control target
= control target key end

     0   :  { %vm4382_vm0 = vmmov 0   ;;  %s4384_s23 = smov 64   ;;  %vm181_vm1 = vcmask 523264   ;;  %vm339_vm2 = vcmask 64512   ;;  %vm1835_vm3 = vcmask 130048   ;;  %s5307_s1 = inlined_call_operand.vmem [shape: f32[256,256], index: 1, kind: input, shape index: {}]   ;;  %s5308_s0 = inlined_call_operand.vmem [shape: f32[8,256], index: 0, kind: input, shape index: {}]   ;;  %s5309_s2 = inlined_call_operand.vmem [shape: f32[9,64,64], index: 2, kind: input, shape index: {}]   ;;  %s5310_s3 = inlined_call_operand.vmem [shape: f32[9,16,8], index: 3, kind: input, shape index: {}]   ;;  %s5311_s5 = inlined_call_operand.vmem [shape: f32[2,16,1], index: 5, kind: input, shape index: {}]   ;;  %s5312_s4 = inlined_call_operand.vmem [shape: f32[9,16,16], index: 4, kind: input, shape index: {}]   ;;  %s5313_s6 = inlined_call_operand.vmem [shape: f32[16,64], index: 6, kind: output, shape index: {}]  }
   0x1   :  { %v26_v0 = vld [vmem:[%s5307_s1 + $0x8] sm:$0xff]  ;;  %v28_v1 = vld [vmem:[%s5307_s1 + $0x18] sm:$0xff]  ;;  %v25_v2 = vld [vmem:[%s5307_s1] sm:$0xff] }
   0x2   :  { %v3990_v3 = vpack.c.bf16 %v28_v1, %v26_v0  ;;  %v27_v4 = vld [vmem:[%s5307_s1 + $0x10] sm:$0xff]  ;;  %v30_v5 = vld [vmem:[%s5307_s1 + $0x28] sm:$0xff]  ;;  %v32_v6 = vld [vmem:[%s5307_s1 + $0x38] sm:$0xff] }
   0x3   :  { %v3992_v7 = vpack.c.bf16 %v27_v4, %v25_v2  ;;  %v3994_v8 = vpack.c.bf16 %v32_v6, %v30_v5  ;;  %v29_v9 = vld [vmem:[%s5307_s1 + $0x20] sm:$0xff]  ;;  %v31_v10 = vld [vmem:[%s5307_s1 + $0x30] sm:$0xff]  ;;  %v34_v11 = vld [vmem:[%s5307_s1 + $0x48] sm:$0xff] }
   0x4   :  { %3991 = vmatprep.subr.bf16.mxu0 %v3990_v3  ;;  %v36_v12 = vld [vmem:[%s5307_s1 + $0x58] sm:$0xff]  ;;  %v3996_v13 = vpack.c.bf16 %v31_v10, %v29_v9  ;;  %v33_v15 = vld [vmem:[%s5307_s1 + $0x40] sm:$0xff]  ;;  %v35_v16 = vld [vmem:[%s5307_s1 + $0x50] sm:$0xff] }
   0x5   :  { %3993 = vmatpush1.bf16.msra.mxu0 %v3992_v7  ;;  %v3998_v14 = vpack.c.bf16 %v36_v12, %v34_v11  ;;  %v38_v17 = vld [vmem:[%s5307_s1 + $0x68] sm:$0xff]  ;;  %v40_v18 = vld [vmem:[%s5307_s1 + $0x78] sm:$0xff]  ;;  %v4000_v19 = vpack.c.bf16 %v35_v16, %v33_v15  ;;  %v37_v21 = vld [vmem:[%s5307_s1 + $0x60] sm:$0xff] }
   0x6   :  { %3995 = vmatprep.subr.bf16.mxu0 %v3994_v8  ;;  %v4002_v20 = vpack.c.bf16 %v40_v18, %v38_v17  ;;  %v39_v22 = vld [vmem:[%s5307_s1 + $0x70] sm:$0xff]  ;;  %v42_v23 = vld [vmem:[%s5307_s1 + $0x88] sm:$0xff]  ;;  %v44_v24 = vld [vmem:[%s5307_s1 + $0x98] sm:$0xff] }
   0x7   :  { %v4004_v25 = vpack.c.bf16 %v39_v22, %v37_v21  ;;  %v4006_v26 = vpack.c.bf16 %v44_v24, %v42_v23  ;;  %v41_v27 = vld [vmem:[%s5307_s1 + $0x80] sm:$0xff]  ;;  %v43_v28 = vld [vmem:[%s5307_s1 + $0x90] sm:$0xff]  ;;  %v46_v29 = vld [vmem:[%s5307_s1 + $0xa8] sm:$0xff] }
   0x8   :  { %v48_v30 = vld [vmem:[%s5307_s1 + $0xb8] sm:$0xff]  ;;  %v4008_v31 = vpack.c.bf16 %v43_v28, %v41_v27  ;;  %v45_v33 = vld [vmem:[%s5307_s1 + $0xa0] sm:$0xff]  ;;  %v47_v34 = vld [vmem:[%s5307_s1 + $0xb0] sm:$0xff] }
   0x9   :  { %3997 = vmatpush1.bf16.msra.mxu0 %v3996_v13  ;;  %v4010_v32 = vpack.c.bf16 %v48_v30, %v46_v29  ;;  %v50_v35 = vld [vmem:[%s5307_s1 + $0xc8] sm:$0xff]  ;;  %v52_v36 = vld [vmem:[%s5307_s1 + $0xd8] sm:$0xff]  ;;  %v4012_v37 = vpack.c.bf16 %v47_v34, %v45_v33  ;;  %v49_v39 = vld [vmem:[%s5307_s1 + $0xc0] sm:$0xff]  ;;  %v4381_v34 = vmov 0.0|0.0  }
   0xa   :  { %3999 = vmatprep.subr.bf16.mxu0 %v3998_v14  ;;  %v4014_v38 = vpack.c.bf16 %v52_v36, %v50_v35  ;;  %v51_v40 = vld [vmem:[%s5307_s1 + $0xd0] sm:$0xff]  ;;  %v24_v41 = vld [vmem:[%s5308_s0 + $0x8] sm:$0xff]  ;;  %v56_v43 = vld [vmem:[%s5307_s1 + $0xf8] sm:$0xff]  ;;  %4054 = vmatprep.subr.bf16.mxu1 %v4381_v34 }
   0xb   :  { %v54_v42 = vld [vmem:[%s5307_s1 + $0xe8] sm:$0xff]  ;;  %153 = vmatprep.mubr.f32.mxu0 %v24_v41  ;;  %v4016_v44 = vpack.c.bf16 %v51_v40, %v49_v39  ;;  %v53_v46 = vld [vmem:[%s5307_s1 + $0xe0] sm:$0xff]  ;;  %v55_v47 = vld [vmem:[%s5307_s1 + $0xf0] sm:$0xff] }
   0xc   :  { %v4018_v45 = vpack.c.bf16 %v56_v43, %v54_v42  ;;  %v58_v48 = vld [vmem:[%s5307_s1 + $0x108] sm:$0xff]  ;;  %v60_v49 = vld [vmem:[%s5307_s1 + $0x118] sm:$0xff]  ;;  %v4020_v50 = vpack.c.bf16 %v55_v47, %v53_v46  ;;  %v57_v52 = vld [vmem:[%s5307_s1 + $0x100] sm:$0xff]  ;;  %v4383_v47 = vmov 0.0  }
   0xd   :  { %4001 = vmatpush1.bf16.msra.mxu0 %v4000_v19  ;;  %v4022_v51 = vpack.c.bf16 %v60_v49, %v58_v48  ;;  %v59_v53 = vld [vmem:[%s5307_s1 + $0x110] sm:$0xff]  ;;  %v62_v54 = vld [vmem:[%s5307_s1 + $0x128] sm:$0xff]  ;;  %v64_v55 = vld [vmem:[%s5307_s1 + $0x138] sm:$0xff]  ;;  %3556 = vmatprep.mubr.msk.f32.mxu1 %vm4382_vm0, %v4383_v47 }
   0xe   :  { %4003 = vmatprep.subr.bf16.mxu0 %v4002_v20  ;;  %v4024_v56 = vpack.c.bf16 %v59_v53, %v57_v52  ;;  %v4026_v57 = vpack.c.bf16 %v64_v55, %v62_v54  ;;  %v61_v58 = vld [vmem:[%s5307_s1 + $0x120] sm:$0xff]  ;;  %v63_v59 = vld [vmem:[%s5307_s1 + $0x130] sm:$0xff]  ;;  %v66_v60 = vld [vmem:[%s5307_s1 + $0x148] sm:$0xff] }
   0xf   :  { %v68_v61 = vld [vmem:[%s5307_s1 + $0x158] sm:$0xff]  ;;  %v4028_v62 = vpack.c.bf16 %v63_v59, %v61_v58  ;;  %v65_v0 = vld [vmem:[%s5307_s1 + $0x140] sm:$0xff]  ;;  %v67_v1 = vld [vmem:[%s5307_s1 + $0x150] sm:$0xff] }
  0x10   :  { %v4030_v63 = vpack.c.bf16 %v68_v61, %v66_v60  ;;  %v70_v2 = vld [vmem:[%s5307_s1 + $0x168] sm:$0xff]  ;;  %v72_v3 = vld [vmem:[%s5307_s1 + $0x178] sm:$0xff]  ;;  %v4032_v4 = vpack.c.bf16 %v67_v1, %v65_v0  ;;  %v69_v6 = vld [vmem:[%s5307_s1 + $0x160] sm:$0xff] }
  0x11   :  { %4005 = vmatpush1.bf16.msra.mxu0 %v4004_v25  ;;  %v4034_v5 = vpack.c.bf16 %v72_v3, %v70_v2  ;;  %v71_v7 = vld [vmem:[%s5307_s1 + $0x170] sm:$0xff]  ;;  %v74_v8 = vld [vmem:[%s5307_s1 + $0x188] sm:$0xff]  ;;  %v76_v9 = vld [vmem:[%s5307_s1 + $0x198] sm:$0xff] }
  0x12   :  { %4007 = vmatprep.subr.bf16.mxu0 %v4006_v26  ;;  %v4036_v10 = vpack.c.bf16 %v71_v7, %v69_v6  ;;  %v4038_v11 = vpack.c.bf16 %v76_v9, %v74_v8  ;;  %v73_v12 = vld [vmem:[%s5307_s1 + $0x180] sm:$0xff]  ;;  %v75_v13 = vld [vmem:[%s5307_s1 + $0x190] sm:$0xff]  ;;  %v78_v14 = vld [vmem:[%s5307_s1 + $0x1a8] sm:$0xff] }
  0x13   :  { %v80_v15 = vld [vmem:[%s5307_s1 + $0x1b8] sm:$0xff]  ;;  %v4040_v16 = vpack.c.bf16 %v75_v13, %v73_v12  ;;  %v77_v18 = vld [vmem:[%s5307_s1 + $0x1a0] sm:$0xff]  ;;  %v79_v19 = vld [vmem:[%s5307_s1 + $0x1b0] sm:$0xff] }
  0x14   :  { %v4042_v17 = vpack.c.bf16 %v80_v15, %v78_v14  ;;  %v82_v20 = vld [vmem:[%s5307_s1 + $0x1c8] sm:$0xff]  ;;  %v84_v21 = vld [vmem:[%s5307_s1 + $0x1d8] sm:$0xff]  ;;  %v4044_v22 = vpack.c.bf16 %v79_v19, %v77_v18  ;;  %v81_v24 = vld [vmem:[%s5307_s1 + $0x1c0] sm:$0xff] }
  0x15   :  { %4009 = vmatpush1.bf16.msra.mxu0 %v4008_v31  ;;  %v4046_v23 = vpack.c.bf16 %v84_v21, %v82_v20  ;;  %v83_v25 = vld [vmem:[%s5307_s1 + $0x1d0] sm:$0xff]  ;;  %v86_v26 = vld [vmem:[%s5307_s1 + $0x1e8] sm:$0xff]  ;;  %v88_v27 = vld [vmem:[%s5307_s1 + $0x1f8] sm:$0xff] }
  0x16   :  { %4011 = vmatprep.subr.bf16.mxu0 %v4010_v32  ;;  %v4048_v28 = vpack.c.bf16 %v83_v25, %v81_v24  ;;  %v4050_v29 = vpack.c.bf16 %v88_v27, %v86_v26  ;;  %v85_v30 = vld [vmem:[%s5307_s1 + $0x1e0] sm:$0xff]  ;;  %v87_v31 = vld [vmem:[%s5307_s1 + $0x1f0] sm:$0xff]  ;;  %v174_v36 = vld [vmem:[%s5309_s2 + $0x8] sm:$0xff] }
  0x17   :  { %v4052_v32 = vpack.c.bf16 %v87_v31, %v85_v30  ;;  %v23_v33 = vld [vmem:[%s5308_s0] sm:$0xff]  ;;  %v176_v39 = vld [vmem:[%s5309_s2 + $0x18] sm:$0xff]  ;;  %v178_v42 = vld [vmem:[%s5309_s2 + $0x28] sm:$0xff] }
  0x18   :  { %v173_v35 = vld [vmem:[%s5309_s2] sm:$0xff]  ;;  %v3147_v52 = vld [vmem:[%s5309_s2 + $0x48] sm:$0xff]  ;;  %v3148_v58 = vld [vmem:[%s5309_s2 + $0x50] sm:$0xff] }
  0x19   :  { %4013 = vmatpush1.bf16.msra.mxu0 %v4012_v37  ;;  %v175_v37 = vld [vmem:[%s5309_s2 + $0x10] sm:$0xff]  ;;  %v177_v41 = vld [vmem:[%s5309_s2 + $0x20] sm:$0xff]  ;;  %v3149_v59 = vld [vmem:[%s5309_s2 + $0x58] sm:$0xff] }
  0x1a   :  { %4015 = vmatprep.subr.bf16.mxu0 %v4014_v38  ;;  %v4629_v38 = vpack.c.bf16 %v174_v36, %v173_v35  ;;  %v4635_v40 = vpack.c.bf16 %v176_v39, %v175_v37  ;;  %v4646_v43 = vpack.c.bf16 %v178_v42, %v177_v41  ;;  %v4681_v60 = vpack.c.bf16 %v3149_v59, %v3148_v58  ;;  %v3150_v61 = vld [vmem:[%s5309_s2 + $0x60] sm:$0xff]  ;;  %v3152_v0 = vld [vmem:[%s5309_s2 + $0x70] sm:$0xff]  ;;  %v3153_v1 = vld [vmem:[%s5309_s2 + $0x78] sm:$0xff] }
  0x1b   :  { %v4703_v2 = vpack.c.bf16 %v3153_v1, %v3152_v0  ;;  %v255_v3 = vld [vmem:[%s5310_s3] sm:$0xff]  ;;  %v3162_v6 = vld [vmem:[%s5309_s2 + $0x88] sm:$0xff]  ;;  %v3164_v12 = vld [vmem:[%s5309_s2 + $0x98] sm:$0xff] }
  0x1c   :  { %4056 = vmatpush3.bf16.msra.mxu1 %v4629_v38  ;;  %v256_v8 = vld [vmem:[%s5310_s3 + $0x8] sm:$0xff]  ;;  %v3165_v14 = vld [vmem:[%s5309_s2 + $0xa0] sm:$0xff]  ;;  %v3168_v18 = vld [vmem:[%s5309_s2 + $0xb8] sm:$0xff] }
  0x1d   :  { %4017 = vmatpush1.bf16.msra.mxu0 %v4016_v44  ;;  %4057 = vmatprep.subr.bf16.mxu1 %v4381_v34  ;;  %v179_v44 = vld [vmem:[%s5309_s2 + $0x30] sm:$0xff]  ;;  %v3166_v15 = vld [vmem:[%s5309_s2 + $0xa8] sm:$0xff]  ;;  %v3187_v20 = vld [vmem:[%s5309_s2 + $0x100] sm:$0xff] }
  0x1e   :  { %4019 = vmatprep.subr.bf16.mxu0 %v4018_v45  ;;  %v180_v45 = vld [vmem:[%s5309_s2 + $0x38] sm:$0xff]  ;;  %v3188_v21 = vld [vmem:[%s5309_s2 + $0x108] sm:$0xff]  ;;  %v3189_v26 = vld [vmem:[%s5309_s2 + $0x110] sm:$0xff] }
  0x1f   :  { %v4656_v46 = vpack.c.bf16 %v180_v45, %v179_v44  ;;  %v4772_v24 = vpack.c.bf16 %v3188_v21, %v3187_v20  ;;  %v3190_v27 = vld [vmem:[%s5309_s2 + $0x118] sm:$0xff]  ;;  %v3192_v30 = vld [vmem:[%s5309_s2 + $0x128] sm:$0xff]  ;;  %v3200_v36 = vld [vmem:[%s5309_s2 + $0x140] sm:$0xff] }
  0x20   :  { %4059 = vmatpush3.bf16.msra.mxu1 %v4635_v40  ;;  %v3201_v37 = vld [vmem:[%s5309_s2 + $0x148] sm:$0xff]  ;;  %v3202_v41 = vld [vmem:[%s5309_s2 + $0x150] sm:$0xff]  ;;  %v3203_v42 = vld [vmem:[%s5309_s2 + $0x158] sm:$0xff] }
  0x21   :  { %4021 = vmatpush1.bf16.msra.mxu0 %v4020_v50  ;;  %4060 = vmatprep.subr.bf16.mxu1 %v4381_v34  ;;  %v4817_v39 = vpack.c.bf16 %v3201_v37, %v3200_v36  ;;  %v4829_v44 = vpack.c.bf16 %v3203_v42, %v3202_v41  ;;  %v3204_v45 = vld [vmem:[%s5309_s2 + $0x160] sm:$0xff]  ;;  %v3228_v58 = vld [vmem:[%s5309_s2 + $0x1d0] sm:$0xff]  ;;  %v3229_v59 = vld [vmem:[%s5309_s2 + $0x1d8] sm:$0xff] }
  0x22   :  { %4023 = vmatprep.subr.bf16.mxu0 %v4022_v51  ;;  %v3146_v51 = vld [vmem:[%s5309_s2 + $0x40] sm:$0xff]  ;;  %v3231_v0 = vld [vmem:[%s5309_s2 + $0x1e8] sm:$0xff]  ;;  %v3246_v20 = vld [vmem:[%s5309_s2 + $0x238] sm:$0xff] }
  0x23   :  { %v3179_v36 = vld [vmem:[%s5309_s2 + $0xe8] sm:$0xff]  ;;  %v3180_v41 = vld [vmem:[%s5309_s2 + $0xf0] sm:$0xff]  ;;  %v3181_v42 = vld [vmem:[%s5309_s2 + $0xf8] sm:$0xff] }
  0x24   :  { %4062 = vmatpush3.bf16.msra.mxu1 %v4646_v43 }
  0x25   :  { %4025 = vmatpush1.bf16.msra.mxu0 %v4024_v56  ;;  %4063 = vmatprep.subr.bf16.mxu1 %v4381_v34  ;;  %v4668_v56 = vpack.c.bf16 %v3147_v52, %v3146_v51  ;;  %v3207_v51 = vld [vmem:[%s5309_s2 + $0x178] sm:$0xff] }
  0x26   :  { %4027 = vmatprep.subr.bf16.mxu0 %v4026_v57 }
  0x28   :  { %4065 = vmatpush3.bf16.msra.mxu1 %v4656_v46 }
  0x29   :  { %4029 = vmatpush1.bf16.msra.mxu0 %v4028_v62  ;;  %4066 = vmatprep.subr.bf16.mxu1 %v4381_v34  ;;  %v3151_v62 = vld [vmem:[%s5309_s2 + $0x68] sm:$0xff] }
  0x2a   :  { %4031 = vmatprep.subr.bf16.mxu0 %v4030_v63  ;;  %v4693_v63 = vpack.c.bf16 %v3151_v62, %v3150_v61  ;;  %v4873_v61 = vpack.c.bf16 %v3229_v59, %v3228_v58  ;;  %v3230_v62 = vld [vmem:[%s5309_s2 + $0x1e0] sm:$0xff] }
  0x2b   :  { %v4885_v1 = vpack.c.bf16 %v3231_v0, %v3230_v62  ;;  %v3183_v0 = vld [vmem:[%s5310_s3 + $0x30] sm:$0xff] }
  0x2d   :  { %4033 = vmatpush1.bf16.msra.mxu0 %v4032_v4  ;;  %v3155_v4 = vld [vmem:[%s5310_s3 + $0x10] sm:$0xff] }
  0x2e   :  { %4035 = vmatprep.subr.bf16.mxu0 %v4034_v5  ;;  %v3161_v5 = vld [vmem:[%s5309_s2 + $0x80] sm:$0xff] }
  0x2f   :  { %v4726_v9 = vpack.c.bf16 %v3162_v6, %v3161_v5  ;;  %v3239_v6 = vld [vmem:[%s5309_s2 + $0x200] sm:$0xff] }
  0x31   :  { %4037 = vmatpush1.bf16.msra.mxu0 %v4036_v10 }
  0x32   :  { %4039 = vmatprep.subr.bf16.mxu0 %v4038_v11  ;;  %v3163_v11 = vld [vmem:[%s5309_s2 + $0x90] sm:$0xff] }
  0x33   :  { %v4737_v13 = vpack.c.bf16 %v3164_v12, %v3163_v11  ;;  %v3242_v11 = vld [vmem:[%s5309_s2 + $0x218] sm:$0xff] }
  0x35   :  { %4041 = vmatpush1.bf16.msra.mxu0 %v4040_v16  ;;  %v4749_v16 = vpack.c.bf16 %v3166_v15, %v3165_v14  ;;  %v3243_v14 = vld [vmem:[%s5309_s2 + $0x220] sm:$0xff]  ;;  %v3244_v15 = vld [vmem:[%s5309_s2 + $0x228] sm:$0xff] }
  0x36   :  { %4043 = vmatprep.subr.bf16.mxu0 %v4042_v17  ;;  %v3167_v17 = vld [vmem:[%s5309_s2 + $0xb0] sm:$0xff] }
  0x37   :  { %v4759_v19 = vpack.c.bf16 %v3168_v18, %v3167_v17  ;;  %v4929_v17 = vpack.c.bf16 %v3244_v15, %v3243_v14  ;;  %v3245_v18 = vld [vmem:[%s5309_s2 + $0x230] sm:$0xff]  ;;  %v3213_v14 = vld [vmem:[%s5309_s2 + $0x180] sm:$0xff]  ;;  %v3214_v15 = vld [vmem:[%s5309_s2 + $0x188] sm:$0xff] }
  0x38   :  { %v4939_v21 = vpack.c.bf16 %v3246_v20, %v3245_v18  ;;  %v3210_v18 = vld [vmem:[%s5310_s3 + $0x58] sm:$0xff]  ;;  %v5044_v20 = vpack.c.bf16 %v3214_v15, %v3213_v14 }
  0x39   :  { %4045 = vmatpush1.bf16.msra.mxu0 %v4044_v22 }
  0x3a   :  { %4047 = vmatprep.subr.bf16.mxu0 %v4046_v23  ;;  %v3156_v23 = vld [vmem:[%s5310_s3 + $0x18] sm:$0xff] }
  0x3d   :  { %4049 = vmatpush1.bf16.msra.mxu0 %v4048_v28  ;;  %v4785_v28 = vpack.c.bf16 %v3190_v27, %v3189_v26 }
  0x3e   :  { %4051 = vmatprep.subr.bf16.mxu0 %v4050_v29  ;;  %v3191_v29 = vld [vmem:[%s5309_s2 + $0x120] sm:$0xff] }
  0x3f   :  { %v4797_v31 = vpack.c.bf16 %v3192_v30, %v3191_v29  ;;  %v3176_v29 = vld [vmem:[%s5309_s2 + $0xd0] sm:$0xff]  ;;  %v3177_v30 = vld [vmem:[%s5309_s2 + $0xd8] sm:$0xff] }
  0x41   :  { %4053 = vmatpush1.bf16.msra.mxu0 %v4052_v32  ;;  %v3193_v32 = vld [vmem:[%s5309_s2 + $0x130] sm:$0xff] }
  0x44   :  { %154 = vmatmul.mubr.f32.vlgmr.msra.gmra.mrb[0].mxu0 %v23_v33  ;;  %v3194_v33 = vld [vmem:[%s5309_s2 + $0x138] sm:$0xff] }
  0x45   :  { %3580 = vmatprep.mubr.msk.f32.mxu0 %vm339_vm2, %v3155_v4  ;;  %v4807_v35 = vpack.c.bf16 %v3194_v33, %v3193_v32  ;;  %v3233_v4 = vld [vmem:[%s5309_s2 + $0x1f8] sm:$0xff]  ;;  %v4982_v32 = vpack.c.bf16 %v3177_v30, %v3176_v29  ;;  %v3178_v33 = vld [vmem:[%s5309_s2 + $0xe0] sm:$0xff] }
  0x46   :  { %v4994_v37 = vpack.c.bf16 %v3179_v36, %v3178_v33  ;;  %v3220_v29 = vld [vmem:[%s5309_s2 + $0x1b8] sm:$0xff]  ;;  %v3222_v33 = vld [vmem:[%s5310_s3 + $0x60] sm:$0xff]  ;;  %v4385_v36 = vmov 0  }
  0x47   :  { %4379 = vset.pattern.permute.xlu1 %v4385_v36  ;;  %4380 = vset.pattern.permute.xlu0 %v4385_v36  ;;  %v3297_v36 = vld [vmem:[%s5312_s4 + $0x78] sm:$0xff] }
 0x117   :  { %v155_v48 = vpop.f32.mrb[0].mxu0 }
 0x118   :  { %161 = vrot.lane.b32.xlu0 %v155_v48, %s4384_s23  ;;  %v157_v49 = vpop.f32.mrb[1].mxu0 }
 0x11c   :  { %166 = vrot.lane.b32.xlu0 %v157_v49, %s4384_s23 }
 0x18a   :  { %v162_v50 = vpop.permute.xlu0 %161 }
 0x18b   :  { %v164_v54 = vmax.f32 %v155_v48, %v162_v50  ;;  %v3205_v48 = vld [vmem:[%s5309_s2 + $0x168] sm:$0xff]  ;;  %v3206_v50 = vld [vmem:[%s5309_s2 + $0x170] sm:$0xff] }
 0x18c   :  { %v4851_v52 = vpack.c.bf16 %v3207_v51, %v3206_v50 }
 0x18e   :  { %v167_v53 = vpop.permute.xlu0 %166 }
 0x18f   :  { %v169_v55 = vmax.f32 %v157_v49, %v167_v53  ;;  %v4841_v49 = vpack.c.bf16 %v3205_v48, %v3204_v45  ;;  %v3226_v53 = vld [vmem:[%s5309_s2 + $0x1c0] sm:$0xff]  ;;  %v5004_v45 = vpack.c.bf16 %v3181_v42, %v3180_v41 }
 0x190   :  { %v171_v41 = vld [vmem:[%s5311_s5] sm:$0xff] }
 0x191   :  { %v4670_v57 = vmax.f32 %v164_v54, %v169_v55  ;;  %v3227_v54 = vld [vmem:[%s5309_s2 + $0x1c8] sm:$0xff]  ;;  %1659 = vperm.xlu1 %4379, %v171_v41  }
 0x192   :  { %v4861_v55 = vpack.c.bf16 %v3227_v54, %v3226_v53 }
 0x193   :  { %3557 = vmatmul.mubr.msk.f32.vlgmr.msra.gmra.mrb[0].mxu1 %vm181_vm1, %v4670_v57 }
 0x194   :  { %4068 = vmatpush3.bf16.msra.mxu1 %v4668_v56  ;;  %3575 = vmatprep.mubr.msk.f32.mxu1 %vm4382_vm0, %v4383_v47 }
 0x195   :  { %4069 = vmatprep.subr.bf16.mxu1 %v4381_v34 }
 0x198   :  { %4071 = vmatpush3.bf16.msra.mxu1 %v4681_v60 }
 0x199   :  { %4072 = vmatprep.subr.bf16.mxu1 %v4381_v34 }
 0x19c   :  { %4074 = vmatpush3.bf16.msra.mxu1 %v4693_v63 }
 0x19d   :  { %4075 = vmatprep.subr.bf16.mxu1 %v4381_v34 }
 0x1a0   :  { %4077 = vmatpush3.bf16.msra.mxu1 %v4703_v2 }
 0x1a3   :  { %3576 = vmatmul.mubr.msk.f32.vlgmr.msra.gmra.mrb[2].mxu1 %vm181_vm1, %v4670_v57 }
 0x1a4   :  { %3585 = vmatprep.mubr.msk.f32.mxu1 %vm339_vm2, %v255_v3  ;;  %v3232_v3 = vld [vmem:[%s5309_s2 + $0x1f0] sm:$0xff] }
 0x1a5   :  { %v4895_v5 = vpack.c.bf16 %v3233_v4, %v3232_v3  ;;  %v3184_v4 = vld [vmem:[%s5310_s3 + $0x38] sm:$0xff] }
 0x266   :  { %v251_v7 = vpop.f32.mrb[0].mxu1 }
 0x267   :  { %v3558_v10 = vpop.f32.mrb[1].mxu1  ;;  %3583 = vmatprep.subr.mxu1 %v251_v7 }
 0x268   :  { %3584 = vmatpush3.msra.mxu1 %v251_v7  ;;  %v3240_v7 = vld [vmem:[%s5309_s2 + $0x208] sm:$0xff]  ;;  %v3241_v10 = vld [vmem:[%s5309_s2 + $0x210] sm:$0xff] }
 0x269   :  { %4078 = vmatprep.subr.bf16.mxu1 %v4381_v34  ;;  %3586 = vmatmul.mubr.msk.f32.vlgmr.msra.gmra.mrb[4].mxu1 %vm339_vm2, %v256_v8  ;;  %v4905_v8 = vpack.c.bf16 %v3240_v7, %v3239_v6  ;;  %v4917_v12 = vpack.c.bf16 %v3242_v11, %v3241_v10  ;;  %v3196_v7 = vld [vmem:[%s5310_s3 + $0x40] sm:$0xff]  ;;  %v3197_v10 = vld [vmem:[%s5310_s3 + $0x48] sm:$0xff]  ;;  %v3209_v11 = vld [vmem:[%s5310_s3 + $0x50] sm:$0xff] }
 0x26a   :  { %4080 = vmatpush3.bf16.msra.mxu1 %v4726_v9  ;;  %3604 = vmatprep.mubr.msk.f32.mxu1 %vm4382_vm0, %v4383_v47 }
 0x26b   :  { %4081 = vmatprep.subr.bf16.mxu1 %v4381_v34 }
 0x26e   :  { %4083 = vmatpush3.bf16.msra.mxu1 %v4737_v13 }
 0x26f   :  { %4084 = vmatprep.subr.bf16.mxu1 %v4381_v34 }
 0x272   :  { %4086 = vmatpush3.bf16.msra.mxu1 %v4749_v16 }
 0x273   :  { %4087 = vmatprep.subr.bf16.mxu1 %v4381_v34 }
 0x276   :  { %v332_v22 = vpop.f32.mrb[2].mxu1  ;;  %4089 = vmatpush3.bf16.msra.mxu1 %v4759_v19 }
 0x277   :  { %v3577_v25 = vpop.f32.mrb[3].mxu1  ;;  %3578 = vmatprep.subr.mxu0 %v332_v22 }
 0x278   :  { %3579 = vmatpush3.msra.mxu0 %v332_v22  ;;  %v3174_v22 = vld [vmem:[%s5309_s2 + $0xc0] sm:$0xff]  ;;  %v3171_v25 = vld [vmem:[%s5310_s3 + $0x28] sm:$0xff] }
 0x279   :  { %4102 = vmatprep.subr.bf16.mxu0 %v4381_v34  ;;  %3581 = vmatmul.mubr.msk.f32.vlgmr.msra.gmra.mrb[2].mxu0 %vm339_vm2, %v3156_v23 }
 0x27a   :  { %3605 = vmatmul.mubr.msk.f32.vlgmr.msra.gmra.mrb[6].mxu1 %vm181_vm1, %v4670_v57  ;;  %4104 = vmatpush3.bf16.msra.mxu0 %v4772_v24 }
 0x27b   :  { %4105 = vmatprep.subr.bf16.mxu0 %v4381_v34  ;;  %3652 = vmatprep.mubr.msk.f32.mxu0 %vm4382_vm0, %v4383_v47 }
 0x27e   :  { %4107 = vmatpush3.bf16.msra.mxu0 %v4785_v28 }
 0x27f   :  { %4108 = vmatprep.subr.bf16.mxu0 %v4381_v34 }
 0x282   :  { %4110 = vmatpush3.bf16.msra.mxu0 %v4797_v31 }
 0x283   :  { %4111 = vmatprep.subr.bf16.mxu0 %v4381_v34 }
 0x286   :  { %4113 = vmatpush3.bf16.msra.mxu0 %v4807_v35 }
 0x287   :  { %4114 = vmatprep.subr.bf16.mxu0 %v4381_v34 }
 0x289   :  { %3653 = vmatmul.mubr.msk.f32.vlgmr.msra.gmra.mrb[4].mxu0 %vm181_vm1, %v4670_v57 }
 0x28a   :  { %4116 = vmatpush3.bf16.msra.mxu0 %v4817_v39  ;;  %3676 = vmatprep.mubr.msk.f32.mxu0 %vm4382_vm0, %v4383_v47 }
 0x28b   :  { %4117 = vmatprep.subr.bf16.mxu0 %v4381_v34 }
 0x28e   :  { %4119 = vmatpush3.bf16.msra.mxu0 %v4829_v44 }
 0x28f   :  { %4120 = vmatprep.subr.bf16.mxu0 %v4381_v34 }
 0x292   :  { %4122 = vmatpush3.bf16.msra.mxu0 %v4841_v49 }
 0x293   :  { %4123 = vmatprep.subr.bf16.mxu0 %v4381_v34 }
 0x296   :  { %4125 = vmatpush3.bf16.msra.mxu0 %v4851_v52 }
 0x297   :  { %4138 = vmatprep.subr.bf16.mxu0 %v4381_v34 }
 0x299   :  { %3677 = vmatmul.mubr.msk.f32.vlgmr.msra.gmra.mrb[6].mxu0 %vm181_vm1, %v4670_v57 }
 0x29a   :  { %4140 = vmatpush3.bf16.msra.mxu0 %v4861_v55  ;;  %3724 = vmatprep.mubr.msk.f32.mxu0 %vm4382_vm0, %v4383_v47 }
 0x29b   :  { %4141 = vmatprep.subr.bf16.mxu0 %v4381_v34 }
 0x29e   :  { %4143 = vmatpush3.bf16.msra.mxu0 %v4873_v61 }
 0x29f   :  { %4144 = vmatprep.subr.bf16.mxu0 %v4381_v34 }
 0x2a2   :  { %4146 = vmatpush3.bf16.msra.mxu0 %v4885_v1 }
 0x2a3   :  { %4147 = vmatprep.subr.bf16.mxu0 %v4381_v34 }
 0x2a6   :  { %4149 = vmatpush3.bf16.msra.mxu0 %v4895_v5 }
 0x2a7   :  { %4150 = vmatprep.subr.bf16.mxu0 %v4381_v34 }
 0x2a9   :  { %3725 = vmatmul.mubr.msk.f32.vlgmr.msra.gmra.mrb[8].mxu0 %vm181_vm1, %v4670_v57 }
 0x2aa   :  { %4152 = vmatpush3.bf16.msra.mxu0 %v4905_v8  ;;  %3748 = vmatprep.mubr.msk.f32.mxu0 %vm4382_vm0, %v4383_v47 }
 0x2ab   :  { %4153 = vmatprep.subr.bf16.mxu0 %v4381_v34 }
 0x2ae   :  { %4155 = vmatpush3.bf16.msra.mxu0 %v4917_v12 }
 0x2af   :  { %4156 = vmatprep.subr.bf16.mxu0 %v4381_v34 }
 0x2b2   :  { %4158 = vmatpush3.bf16.msra.mxu0 %v4929_v17 }
 0x2b3   :  { %4159 = vmatprep.subr.bf16.mxu0 %v4381_v34 }
 0x2b6   :  { %4161 = vmatpush3.bf16.msra.mxu0 %v4939_v21 }
 0x2b7   :  { %4179 = vmatprep.subr.bf16.mxu0 %v4668_v56 }
 0x2b9   :  { %3749 = vmatmul.mubr.msk.f32.vlgmr.msra.gmra.mrb[10].mxu0 %vm181_vm1, %v4670_v57 }
 0x2ba   :  { %4181 = vmatpush3.bf16.msra.mxu0 %v4668_v56  ;;  %v3175_v56 = vld [vmem:[%s5309_s2 + $0xc8] sm:$0xff] }
 0x2bb   :  { %4183 = vmatprep.subr.bf16.mxu0 %v4681_v60  ;;  %v4962_v23 = vpack.c.bf16 %v3175_v56, %v3174_v22  ;;  %v3215_v22 = vld [vmem:[%s5309_s2 + $0x190] sm:$0xff]  ;;  %v3216_v56 = vld [vmem:[%s5309_s2 + $0x198] sm:$0xff] }
 0x2be   :  { %4185 = vmatpush3.bf16.msra.mxu0 %v4681_v60  ;;  %v3170_v60 = vld [vmem:[%s5310_s3 + $0x20] sm:$0xff] }
 0x2bf   :  { %4187 = vmatprep.subr.bf16.mxu0 %v4693_v63  ;;  %3609 = vmatprep.mubr.msk.f32.mxu1 %vm339_vm2, %v3170_v60  ;;  %v5054_v60 = vpack.c.bf16 %v3216_v56, %v3215_v22  ;;  %v3267_v56 = vld [vmem:[%s5312_s4 + $0x28] sm:$0xff] }
 0x2c2   :  { %4189 = vmatpush3.bf16.msra.mxu0 %v4693_v63 }
 0x2c3   :  { %4191 = vmatprep.subr.bf16.mxu0 %v4703_v2 }
 0x2c6   :  { %4193 = vmatpush3.bf16.msra.mxu0 %v4703_v2 }
 0x2c7   :  { %4223 = vmatprep.subr.bf16.mxu0 %v4962_v23 }
 0x34c   :  { %v4966_v63 = vpop.f32.mrb[2].mxu0 }
 0x34d   :  { %v577_v2 = vpop.f32.mrb[6].mxu1  ;;  %v4971_v26 = vpop.f32.mrb[3].mxu0 }
 0x34e   :  { %v3606_v27 = vpop.f32.mrb[7].mxu1  ;;  %3607 = vmatprep.subr.mxu1 %v577_v2 }
 0x34f   :  { %3608 = vmatpush3.msra.mxu1 %v577_v2  ;;  %v3217_v2 = vld [vmem:[%s5309_s2 + $0x1a0] sm:$0xff] }
 0x350   :  { %4090 = vmatprep.subr.bf16.mxu1 %v4381_v34  ;;  %3610 = vmatmul.mubr.msk.f32.vlgmr.msra.gmra.mrb[4].mxu1 %vm339_vm2, %v3171_v25  ;;  %v3218_v25 = vld [vmem:[%s5309_s2 + $0x1a8] sm:$0xff] }
 0x351   :  { %4092 = vmatpush3.bf16.msra.mxu1 %v4962_v23  ;;  %3628 = vmatprep.mubr.msk.f32.mxu1 %vm4382_vm0, %v4383_v47  ;;  %v5066_v27 = vpack.c.bf16 %v3218_v25, %v3217_v2  ;;  %v3273_v2 = vld [vmem:[%s5312_s4 + $0x38] sm:$0xff]  ;;  %v3278_v25 = vld [vmem:[%s5312_s4 + $0x40] sm:$0xff] }
 0x352   :  { %4093 = vmatprep.subr.bf16.mxu1 %v4381_v34 }
 0x355   :  { %4095 = vmatpush3.bf16.msra.mxu1 %v4982_v32 }
 0x356   :  { %4096 = vmatprep.subr.bf16.mxu1 %v4381_v34 }
 0x359   :  { %4098 = vmatpush3.bf16.msra.mxu1 %v4994_v37 }
 0x35a   :  { %4099 = vmatprep.subr.bf16.mxu1 %v4381_v34 }
 0x35c   :  { %v907_v48 = vpop.f32.mrb[4].mxu0 }
 0x35d   :  { %4101 = vmatpush3.bf16.msra.mxu1 %v5004_v45  ;;  %v3654_v50 = vpop.f32.mrb[5].mxu0 }
 0x360   :  { %3629 = vmatmul.mubr.msk.f32.vlgmr.msra.gmra.mrb[8].mxu1 %vm181_vm1, %v4670_v57 }
 0x361   :  { %3633 = vmatprep.mubr.msk.f32.mxu1 %vm339_vm2, %v3183_v0 }
 0x36c   :  { %v1072_v51 = vpop.f32.mrb[6].mxu0 }
 0x36d   :  { %v3678_v53 = vpop.f32.mrb[7].mxu0 }
 0x36e   :  { %v3236_v53 = vld [vmem:[%s5310_s3 + $0x78] sm:$0xff] }
 0x37c   :  { %v5010_v54 = vpop.f32.mrb[8].mxu0 }
 0x37d   :  { %v3726_v58 = vpop.f32.mrb[9].mxu0 }
 0x37e   :  { %v3248_v58 = vld [vmem:[%s5310_s3 + $0x80] sm:$0xff] }
 0x38c   :  { %v5012_v59 = vpop.f32.mrb[10].mxu0 }
 0x38d   :  { %v3750_v62 = vpop.f32.mrb[11].mxu0 }
 0x433   :  { %v742_v3 = vpop.f32.mrb[8].mxu1 }
 0x434   :  { %v3630_v6 = vpop.f32.mrb[9].mxu1  ;;  %3631 = vmatprep.subr.mxu1 %v742_v3 }
 0x435   :  { %3632 = vmatpush3.msra.mxu1 %v742_v3 }
 0x436   :  { %3634 = vmatmul.mubr.msk.f32.vlgmr.msra.gmra.mrb[4].mxu1 %vm339_vm2, %v3184_v4  ;;  %3655 = vmatprep.subr.mxu1 %v907_v48 }
 0x437   :  { %3656 = vmatpush3.msra.mxu1 %v907_v48  ;;  %3657 = vmatprep.mubr.msk.f32.mxu1 %vm339_vm2, %v3196_v7  ;;  %v3223_v48 = vld [vmem:[%s5310_s3 + $0x68] sm:$0xff] }
 0x438   :  { %3679 = vmatprep.subr.mxu1 %v1072_v51 }
 0x43e   :  { %3658 = vmatmul.mubr.msk.f32.vlgmr.msra.gmra.mrb[4].mxu1 %vm339_vm2, %v3197_v10 }
 0x43f   :  { %3680 = vmatpush3.msra.mxu1 %v1072_v51  ;;  %3681 = vmatprep.mubr.msk.f32.mxu1 %vm339_vm2, %v3209_v11  ;;  %v3235_v51 = vld [vmem:[%s5310_s3 + $0x70] sm:$0xff] }
 0x440   :  { %4126 = vmatprep.subr.bf16.mxu1 %v4381_v34 }
 0x446   :  { %3682 = vmatmul.mubr.msk.f32.vlgmr.msra.gmra.mrb[4].mxu1 %vm339_vm2, %v3210_v18 }
 0x447   :  { %4128 = vmatpush3.bf16.msra.mxu1 %v5044_v20  ;;  %3700 = vmatprep.mubr.msk.f32.mxu1 %vm4382_vm0, %v4383_v47  ;;  %v3219_v47 = vld [vmem:[%s5309_s2 + $0x1b0] sm:$0xff] }
 0x448   :  { %4129 = vmatprep.subr.bf16.mxu1 %v4381_v34  ;;  %v5076_v30 = vpack.c.bf16 %v3220_v29, %v3219_v47 }
 0x44b   :  { %4131 = vmatpush3.bf16.msra.mxu1 %v5054_v60 }
 0x44c   :  { %4132 = vmatprep.subr.bf16.mxu1 %v4381_v34 }
 0x44f   :  { %4134 = vmatpush3.bf16.msra.mxu1 %v5066_v27 }
 0x450   :  { %4135 = vmatprep.subr.bf16.mxu1 %v4381_v34  ;;  %v172_v34 = vld [vmem:[%s5311_s5 + $0x8] sm:$0xff] }
 0x451   :  { %1664 = vperm.xlu1 %4379, %v172_v34  }
 0x453   :  { %4137 = vmatpush3.bf16.msra.mxu1 %v5076_v30 }
 0x456   :  { %3701 = vmatmul.mubr.msk.f32.vlgmr.msra.gmra.mrb[10].mxu1 %vm181_vm1, %v4670_v57  ;;  %v3253_v57 = vld [vmem:[%s5311_s5 + $0x18] sm:$0xff] }
 0x457   :  { %3705 = vmatprep.mubr.msk.f32.mxu1 %vm339_vm2, %v3222_v33  ;;  %3132 = vperm.xlu1 %4379, %v3253_v57   ;;  %v3296_v33 = vld [vmem:[%s5312_s4 + $0x70] sm:$0xff] }
 0x529   :  { %v1237_v42 = vpop.f32.mrb[10].mxu1 }
 0x52a   :  { %v3702_v50 = vpop.f32.mrb[11].mxu1  ;;  %3703 = vmatprep.subr.mxu1 %v1237_v42 }
 0x52b   :  { %3704 = vmatpush3.msra.mxu1 %v1237_v42 }
 0x52c   :  { %3706 = vmatmul.mubr.msk.f32.vlgmr.msra.gmra.mrb[4].mxu1 %vm339_vm2, %v3223_v48  ;;  %3727 = vmatprep.subr.mxu1 %v5010_v54 }
 0x52d   :  { %3728 = vmatpush3.msra.mxu1 %v5010_v54  ;;  %3729 = vmatprep.mubr.msk.f32.mxu1 %vm339_vm2, %v3235_v51  ;;  %v3249_v54 = vld [vmem:[%s5310_s3 + $0x88] sm:$0xff] }
 0x52e   :  { %3751 = vmatprep.subr.mxu1 %v5012_v59 }
 0x534   :  { %3730 = vmatmul.mubr.msk.f32.vlgmr.msra.gmra.mrb[4].mxu1 %vm339_vm2, %v3236_v53 }
 0x535   :  { %3752 = vmatpush3.msra.mxu1 %v5012_v59  ;;  %3753 = vmatprep.mubr.msk.f32.mxu1 %vm339_vm2, %v3248_v58  ;;  %v1660_v59 = vpop.permute.xlu1 %1659 }
 0x536   :  { %4163 = vmatprep.subr.bf16.mxu1 %v4629_v38 }
 0x539   :  { %v1665_v4 = vpop.permute.xlu1 %1664 }
 0x53c   :  { %3754 = vmatmul.mubr.msk.f32.vlgmr.msra.gmra.mrb[4].mxu1 %vm339_vm2, %v3249_v54 }
 0x53d   :  { %4165 = vmatpush3.bf16.msra.mxu1 %v4629_v38  ;;  %v3133_v42 = vpop.permute.xlu1 %3132 }
 0x53e   :  { %4167 = vmatprep.subr.bf16.mxu1 %v4635_v40 }
 0x541   :  { %4169 = vmatpush3.bf16.msra.mxu1 %v4635_v40 }
 0x542   :  { %4171 = vmatprep.subr.bf16.mxu1 %v4646_v43 }
 0x545   :  { %4173 = vmatpush3.bf16.msra.mxu1 %v4646_v43  ;;  %v3258_v43 = vld [vmem:[%s5312_s4 + $0x10] sm:$0xff] }
 0x546   :  { %4175 = vmatprep.subr.bf16.mxu1 %v4656_v46 }
 0x549   :  { %4177 = vmatpush3.bf16.msra.mxu1 %v4656_v46 }
 0x60f   :  { %v3755_v62 = vpop.f32.mrb[4].mxu1 }
 0x610   :  { %v4342_v0 = vadd.f32 %v3755_v62, %v4966_v63  ;;  %v1646_v3 = vpop.f32.mrb[5].mxu1 }
 0x611   :  { %v4343_v38 = vadd.f32 %v1646_v3, %v4971_v26 }
 0x612   :  { %v1668_v6 = vadd.f32 %v4342_v0, %v1665_v4 }
 0x613   :  { %v1667_v7 = vadd.f32 %v4343_v38, %v1660_v59 }
 0x614   :  { %v5131_v40 = vmax.f32 %v1668_v6, 0.0 }
 0x615   :  { %v5129_v10 = vmax.f32 %v1667_v7, 0.0 }
 0x617   :  { %3772 = vmatprep.mubr.msk.f32.mxu1 %vm181_vm1, %v5129_v10  ;;  %3791 = vmatprep.mubr.msk.f32.mxu0 %vm181_vm1, %v5129_v10 }
 0x618   :  { %3773 = vmatmul.mubr.msk.f32.vlgmr.msra.gmra.mrb[12].mxu1 %vm181_vm1, %v5131_v40  ;;  %3792 = vmatmul.mubr.msk.f32.vlgmr.msra.gmra.mrb[12].mxu0 %vm181_vm1, %v5131_v40 }
 0x619   :  { %4225 = vmatpush3.bf16.msra.mxu0 %v4962_v23  ;;  %3850 = vmatprep.mubr.msk.f32.mxu0 %vm181_vm1, %v5129_v10 }
 0x61a   :  { %4227 = vmatprep.subr.bf16.mxu0 %v4982_v32  ;;  %3798 = vmatprep.mubr.msk.f32.mxu1 %vm1835_vm3, %v3258_v43 }
 0x61d   :  { %4229 = vmatpush3.bf16.msra.mxu0 %v4982_v32 }
 0x61e   :  { %4231 = vmatprep.subr.bf16.mxu0 %v4994_v37 }
 0x621   :  { %4233 = vmatpush3.bf16.msra.mxu0 %v4994_v37 }
 0x622   :  { %4235 = vmatprep.subr.bf16.mxu0 %v5004_v45 }
 0x625   :  { %4237 = vmatpush3.bf16.msra.mxu0 %v5004_v45 }
 0x626   :  { %4243 = vmatprep.subr.bf16.mxu0 %v4772_v24 }
 0x628   :  { %3851 = vmatmul.mubr.msk.f32.vlgmr.msra.gmra.mrb[14].mxu0 %vm181_vm1, %v5131_v40 }
 0x629   :  { %4245 = vmatpush3.bf16.msra.mxu0 %v4772_v24  ;;  %3876 = vmatprep.mubr.msk.f32.mxu0 %vm181_vm1, %v5129_v10 }
 0x62a   :  { %4247 = vmatprep.subr.bf16.mxu0 %v4785_v28 }
 0x62d   :  { %4249 = vmatpush3.bf16.msra.mxu0 %v4785_v28 }
 0x62e   :  { %4251 = vmatprep.subr.bf16.mxu0 %v4797_v31 }
 0x631   :  { %4253 = vmatpush3.bf16.msra.mxu0 %v4797_v31 }
 0x632   :  { %4255 = vmatprep.subr.bf16.mxu0 %v4807_v35 }
 0x635   :  { %4257 = vmatpush3.bf16.msra.mxu0 %v4807_v35 }
 0x636   :  { %4283 = vmatprep.subr.bf16.mxu0 %v5044_v20 }
 0x638   :  { %3877 = vmatmul.mubr.msk.f32.vlgmr.msra.gmra.mrb[16].mxu0 %vm181_vm1, %v5131_v40 }
 0x639   :  { %4285 = vmatpush3.bf16.msra.mxu0 %v5044_v20  ;;  %3928 = vmatprep.mubr.msk.f32.mxu0 %vm181_vm1, %v5129_v10 }
 0x63a   :  { %4287 = vmatprep.subr.bf16.mxu0 %v5054_v60 }
 0x63d   :  { %4289 = vmatpush3.bf16.msra.mxu0 %v5054_v60  ;;  %v3272_v60 = vld [vmem:[%s5312_s4 + $0x30] sm:$0xff] }
 0x63e   :  { %4291 = vmatprep.subr.bf16.mxu0 %v5066_v27 }
 0x641   :  { %4293 = vmatpush3.bf16.msra.mxu0 %v5066_v27  ;;  %v3279_v27 = vld [vmem:[%s5312_s4 + $0x48] sm:$0xff] }
 0x642   :  { %4295 = vmatprep.subr.bf16.mxu0 %v5076_v30 }
 0x645   :  { %4297 = vmatpush3.bf16.msra.mxu0 %v5076_v30  ;;  %v3291_v30 = vld [vmem:[%s5312_s4 + $0x68] sm:$0xff] }
 0x646   :  { %4303 = vmatprep.subr.bf16.mxu0 %v4861_v55 }
 0x648   :  { %3929 = vmatmul.mubr.msk.f32.vlgmr.msra.gmra.mrb[18].mxu0 %vm181_vm1, %v5131_v40 }
 0x649   :  { %4305 = vmatpush3.bf16.msra.mxu0 %v4861_v55  ;;  %3954 = vmatprep.mubr.msk.f32.mxu0 %vm181_vm1, %v5129_v10 }
 0x64a   :  { %4307 = vmatprep.subr.bf16.mxu0 %v4873_v61 }
 0x64d   :  { %4309 = vmatpush3.bf16.msra.mxu0 %v4873_v61  ;;  %v3259_v61 = vld [vmem:[%s5312_s4 + $0x18] sm:$0xff] }
 0x64e   :  { %4311 = vmatprep.subr.bf16.mxu0 %v4885_v1 }
 0x651   :  { %4313 = vmatpush3.bf16.msra.mxu0 %v4885_v1  ;;  %v1755_v1 = vld [vmem:[%s5312_s4] sm:$0xff] }
 0x652   :  { %4315 = vmatprep.subr.bf16.mxu0 %v4895_v5 }
 0x655   :  { %4317 = vmatpush3.bf16.msra.mxu0 %v4895_v5  ;;  %v1756_v5 = vld [vmem:[%s5312_s4 + $0x8] sm:$0xff] }
 0x658   :  { %3955 = vmatmul.mubr.msk.f32.vlgmr.msra.gmra.mrb[20].mxu0 %vm181_vm1, %v5131_v40 }
 0x6eb   :  { %v3774_v46 = vpop.f32.mrb[12].mxu1  ;;  %v3793_v24 = vpop.f32.mrb[12].mxu0 }
 0x6ec   :  { %v1746_v28 = vpop.f32.mrb[13].mxu1  ;;  %v1823_v31 = vpop.f32.mrb[13].mxu0 }
 0x6ed   :  { %v4198_v35 = vpack.c.bf16 %v3774_v46, %v1746_v28  ;;  %v4194_v55 = vpack.c.bf16 %v3793_v24, %v1823_v31 }
 0x6ef   :  { %4195 = vmatprep.subr.bf16.mxu1 %v4194_v55 }
 0x6f0   :  { %4197 = vmatpush3.bf16.msra.mxu1 %v4194_v55 }
 0x6f1   :  { %4199 = vmatprep.subr.bf16.mxu1 %v4198_v35 }
 0x6f3   :  { %3799 = vmatmul.mubr.msk.f32.vlgmr.msra.gmra.mrb[14].mxu1 %vm1835_vm3, %v3259_v61 }
 0x6f4   :  { %4201 = vmatpush3.bf16.msra.mxu1 %v4198_v35  ;;  %3805 = vmatprep.mubr.msk.f32.mxu1 %vm1835_vm3, %v1755_v1 }
 0x6f5   :  { %4203 = vmatprep.subr.bf16.mxu1 %v4726_v9 }
 0x6fb   :  { %v3852_v23 = vpop.f32.mrb[14].mxu0  ;;  %3806 = vmatmul.mubr.msk.f32.vlgmr.msra.gmra.mrb[14].mxu1 %vm1835_vm3, %v1756_v5 }
 0x6fc   :  { %4205 = vmatpush3.bf16.msra.mxu1 %v4726_v9  ;;  %v2225_v63 = vpop.f32.mrb[15].mxu0  ;;  %3824 = vmatprep.mubr.msk.f32.mxu1 %vm181_vm1, %v5129_v10 }
 0x6fd   :  { %v4238_v26 = vpack.c.bf16 %v3852_v23, %v2225_v63  ;;  %4207 = vmatprep.subr.bf16.mxu1 %v4737_v13 }
 0x700   :  { %4209 = vmatpush3.bf16.msra.mxu1 %v4737_v13 }
 0x701   :  { %4211 = vmatprep.subr.bf16.mxu1 %v4749_v16 }
 0x704   :  { %4213 = vmatpush3.bf16.msra.mxu1 %v4749_v16  ;;  %v3266_v16 = vld [vmem:[%s5312_s4 + $0x20] sm:$0xff] }
 0x705   :  { %4215 = vmatprep.subr.bf16.mxu1 %v4759_v19 }
 0x708   :  { %4217 = vmatpush3.bf16.msra.mxu1 %v4759_v19 }
 0x70b   :  { %3825 = vmatmul.mubr.msk.f32.vlgmr.msra.gmra.mrb[16].mxu1 %vm181_vm1, %v5131_v40  ;;  %v3878_v9 = vpop.f32.mrb[16].mxu0 }
 0x70c   :  { %v2386_v32 = vpop.f32.mrb[17].mxu0  ;;  %3831 = vmatprep.mubr.msk.f32.mxu1 %vm1835_vm3, %v3266_v16 }
 0x70d   :  { %v4258_v37 = vpack.c.bf16 %v3878_v9, %v2386_v32 }
 0x71b   :  { %v3930_v45 = vpop.f32.mrb[18].mxu0 }
 0x71c   :  { %v2708_v11 = vpop.f32.mrb[19].mxu0 }
 0x71d   :  { %v4298_v14 = vpack.c.bf16 %v3930_v45, %v2708_v11 }
 0x72b   :  { %v3956_v15 = vpop.f32.mrb[20].mxu0 }
 0x72c   :  { %v2869_v18 = vpop.f32.mrb[21].mxu0 }
 0x72d   :  { %v4318_v13 = vpack.c.bf16 %v3956_v15, %v2869_v18 }
 0x7de   :  { %v3826_v20 = vpop.f32.mrb[16].mxu1 }
 0x7df   :  { %v2064_v19 = vpop.f32.mrb[17].mxu1 }
 0x7e0   :  { %v4218_v22 = vpack.c.bf16 %v3826_v20, %v2064_v19 }
 0x7e2   :  { %4219 = vmatprep.subr.bf16.mxu1 %v4218_v22 }
 0x7e3   :  { %4221 = vmatpush3.bf16.msra.mxu1 %v4218_v22 }
 0x7e4   :  { %4239 = vmatprep.subr.bf16.mxu1 %v4238_v26 }
 0x7e6   :  { %3832 = vmatmul.mubr.msk.f32.vlgmr.msra.gmra.mrb[14].mxu1 %vm1835_vm3, %v3267_v56 }
 0x7e7   :  { %4241 = vmatpush3.bf16.msra.mxu1 %v4238_v26  ;;  %3857 = vmatprep.mubr.msk.f32.mxu1 %vm1835_vm3, %v3272_v60 }
 0x7e8   :  { %4259 = vmatprep.subr.bf16.mxu1 %v4258_v37 }
 0x7ee   :  { %3858 = vmatmul.mubr.msk.f32.vlgmr.msra.gmra.mrb[14].mxu1 %vm1835_vm3, %v3273_v2 }
 0x7ef   :  { %4261 = vmatpush3.bf16.msra.mxu1 %v4258_v37  ;;  %3883 = vmatprep.mubr.msk.f32.mxu1 %vm1835_vm3, %v3278_v25 }
 0x7f0   :  { %4263 = vmatprep.subr.bf16.mxu1 %v4817_v39 }
 0x7f6   :  { %3884 = vmatmul.mubr.msk.f32.vlgmr.msra.gmra.mrb[14].mxu1 %vm1835_vm3, %v3279_v27 }
 0x7f7   :  { %4265 = vmatpush3.bf16.msra.mxu1 %v4817_v39  ;;  %3902 = vmatprep.mubr.msk.f32.mxu1 %vm181_vm1, %v5129_v10  ;;  %v3284_v39 = vld [vmem:[%s5312_s4 + $0x50] sm:$0xff] }
 0x7f8   :  { %4267 = vmatprep.subr.bf16.mxu1 %v4829_v44 }
 0x7fb   :  { %4269 = vmatpush3.bf16.msra.mxu1 %v4829_v44 }
 0x7fc   :  { %4271 = vmatprep.subr.bf16.mxu1 %v4841_v49 }
 0x7ff   :  { %4273 = vmatpush3.bf16.msra.mxu1 %v4841_v49  ;;  %v3285_v49 = vld [vmem:[%s5312_s4 + $0x58] sm:$0xff] }
 0x800   :  { %4275 = vmatprep.subr.bf16.mxu1 %v4851_v52 }
 0x803   :  { %4277 = vmatpush3.bf16.msra.mxu1 %v4851_v52  ;;  %v3290_v52 = vld [vmem:[%s5312_s4 + $0x60] sm:$0xff] }
 0x806   :  { %3903 = vmatmul.mubr.msk.f32.vlgmr.msra.gmra.mrb[18].mxu1 %vm181_vm1, %v5131_v40 }
 0x807   :  { %3909 = vmatprep.mubr.msk.f32.mxu1 %vm1835_vm3, %v3284_v39 }
 0x8d9   :  { %v3904_v47 = vpop.f32.mrb[18].mxu1 }
 0x8da   :  { %v2547_v29 = vpop.f32.mrb[19].mxu1 }
 0x8db   :  { %v4278_v44 = vpack.c.bf16 %v3904_v47, %v2547_v29 }
 0x8dd   :  { %4279 = vmatprep.subr.bf16.mxu1 %v4278_v44 }
 0x8de   :  { %4281 = vmatpush3.bf16.msra.mxu1 %v4278_v44 }
 0x8df   :  { %4299 = vmatprep.subr.bf16.mxu1 %v4298_v14 }
 0x8e1   :  { %3910 = vmatmul.mubr.msk.f32.vlgmr.msra.gmra.mrb[14].mxu1 %vm1835_vm3, %v3285_v49 }
 0x8e2   :  { %4301 = vmatpush3.bf16.msra.mxu1 %v4298_v14  ;;  %3935 = vmatprep.mubr.msk.f32.mxu1 %vm1835_vm3, %v3290_v52 }
 0x8e3   :  { %4319 = vmatprep.subr.bf16.mxu1 %v4318_v13 }
 0x8e9   :  { %3936 = vmatmul.mubr.msk.f32.vlgmr.msra.gmra.mrb[14].mxu1 %vm1835_vm3, %v3291_v30 }
 0x8ea   :  { %4321 = vmatpush3.bf16.msra.mxu1 %v4318_v13  ;;  %3961 = vmatprep.mubr.msk.f32.mxu1 %vm1835_vm3, %v3296_v33 }
 0x8eb   :  { %4323 = vmatprep.subr.bf16.mxu1 %v4905_v8 }
 0x8f1   :  { %3962 = vmatmul.mubr.msk.f32.vlgmr.msra.gmra.mrb[14].mxu1 %vm1835_vm3, %v3297_v36 }
 0x8f2   :  { %4325 = vmatpush3.bf16.msra.mxu1 %v4905_v8  ;;  %3980 = vmatprep.mubr.msk.f32.mxu1 %vm181_vm1, %v5129_v10  ;;  %v3302_v8 = vld [vmem:[%s5312_s4 + $0x80] sm:$0xff] }
 0x8f3   :  { %4327 = vmatprep.subr.bf16.mxu1 %v4917_v12 }
 0x8f6   :  { %4329 = vmatpush3.bf16.msra.mxu1 %v4917_v12  ;;  %v3252_v12 = vld [vmem:[%s5311_s5 + $0x10] sm:$0xff] }
 0x8f7   :  { %4331 = vmatprep.subr.bf16.mxu1 %v4929_v17  ;;  %3127 = vperm.xlu0 %4380, %v3252_v12  }
 0x8fa   :  { %4333 = vmatpush3.bf16.msra.mxu1 %v4929_v17 }
 0x8fb   :  { %4335 = vmatprep.subr.bf16.mxu1 %v4939_v21 }
 0x8fe   :  { %4337 = vmatpush3.bf16.msra.mxu1 %v4939_v21  ;;  %v3303_v21 = vld [vmem:[%s5312_s4 + $0x88] sm:$0xff] }
 0x901   :  { %3981 = vmatmul.mubr.msk.f32.vlgmr.msra.gmra.mrb[20].mxu1 %vm181_vm1, %v5131_v40 }
 0x902   :  { %3987 = vmatprep.mubr.msk.f32.mxu1 %vm1835_vm3, %v3302_v8 }
 0x976   :  { %v3128_v57 = vpop.permute.xlu0 %3127 }
 0x9d4   :  { %v3982_v41 = vpop.f32.mrb[20].mxu1 }
 0x9d5   :  { %v3030_v17 = vpop.f32.mrb[21].mxu1 }
 0x9d6   :  { %v4338_v34 = vpack.c.bf16 %v3982_v41, %v3030_v17 }
 0x9d8   :  { %4339 = vmatprep.subr.bf16.mxu1 %v4338_v34 }
 0x9d9   :  { %4341 = vmatpush3.bf16.msra.mxu1 %v4338_v34 }
 0x9dc   :  { %3988 = vmatmul.mubr.msk.f32.vlgmr.msra.gmra.mrb[14].mxu1 %vm1835_vm3, %v3303_v21 }
 0xaaf   :  { %v3989_v48 = vpop.f32.mrb[14].mxu1 }
 0xab0   :  { %v3136_v50 = vadd.f32 %v3989_v48, %v3133_v42  ;;  %v3114_v51 = vpop.f32.mrb[15].mxu1 }
 0xab1   :  { %v3135_v53 = vadd.f32 %v3128_v57, %v3114_v51 }
 0xab2   :  { %v3138_v58 = vmax.f32 %v3136_v50, 0.0 }
 0xab3   :  { %v3137_v54 = vmax.f32 %v3135_v53, 0.0 }
 0xab4   :  { %3140 = vst.msk [vmem:[%s5313_s6 + $0x8] sm:$0xff] %vm181_vm1, %v3138_v58 }
 0xab5   :  { %3139 = vst.msk [vmem:[%s5313_s6] sm:$0xff] %vm181_vm1, %v3137_v54 }

</bundles_post_ra>
